<compile_context>
chip_gen: v5e
topology: v5e:2x2
jax: 0.10.0
libtpu: 0.0.40
codegen_flags: <defaults>
</compile_context>

<pallas_src>
import functools

import jax
import jax.numpy as jnp
from jax.experimental import pallas as pl
from jax.experimental.pallas import tpu as pltpu

EPS = 1e-5          # InstanceNorm2d default eps
NEG_SLOPE = 0.2     # LeakyReLU slope


def _basicblock_kernel(x_ref, w_ref, o_ref, slab_ref, *, kz, st, Ho, Wo, Cin):
    # x_ref   : (Hp, Wp, Cin)   zero-padded NHWC sample (batch dim squeezed)
    # w_ref   : (CTC, K)        conv weights for this Cout tile, K = kz*kz*Cin,
    #                           K ordered (dy, dx, cin) to match the slab columns
    # o_ref   : (CTC, HW)       channel-major output tile (HW lane-dense)
    # slab_ref: (HW, K)         VMEM im2col slab scratch
    HW = Ho * Wo

    # --- im2col into VMEM: kz^2 shifted-window copies, each writing Cin lanes. ---
    for dy in range(kz):
        for dx in range(kz):
            if st == 1:
                xs = x_ref[pl.ds(dy, Ho), pl.ds(dx, Wo), :]
            else:
                # TODO(synk): for st > 1 de-interleave columns once instead of a 2-D
                # strided slice per tap (this branch is not exercised by the test).
                xs = x_ref[pl.ds(dy, Ho, stride=st), pl.ds(dx, Wo, stride=st), :]
            # (Ho, Wo, Cin) -> (HW, Cin); layout-trivial merge when Wo % 8 == 0.
            xs = xs.reshape(HW, Cin)
            slab_ref[:, pl.ds((dy * kz + dx) * Cin, Cin)] = xs

    # --- one MXU matmul: (CTC, K) @ (K, HW), f32 accumulation (q @ k.T pattern). ---
    y = jnp.dot(w_ref[...], slab_ref[...].T, preferred_element_type=jnp.float32)

    # --- InstanceNorm2d (affine=False, biased variance) + LeakyReLU(0.2). ---
    # Channels sit in sublanes, HW in lanes -> per-channel stats are lane reductions.
    # Conv bias is intentionally omitted: y - mean cancels a per-channel constant.
    mean = jnp.mean(y, axis=1, keepdims=True)            # (CTC, 1)
    d = y - mean
    var = jnp.mean(d * d, axis=1, keepdims=True)
    yn = d * jax.lax.rsqrt(var + EPS)
    o_ref[...] = jnp.maximum(yn, NEG_SLOPE * yn).astype(o_ref.dtype)


@functools.partial(jax.jit, static_argnames=("kz", "st", "pd"))
def basicblock_forward(x_nchw, weight, bias, *, kz, st, pd):
    """Equivalent of basicblock.forward.

    x_nchw : (N, Cin, H, W)
    weight : (Cout, Cin, kz, kz)   -- PyTorch Conv2d layout
    bias   : (Cout,)               -- accepted but unused (cancelled by InstanceNorm)
    returns: (N, Cout, Ho, Wo)
    """
    del bias  # InstanceNorm2d(affine=False) cancels a per-channel constant bias.

    N, Cin, H, W = x_nchw.shape
    Cout = weight.shape[0]
    Ho = (H + 2 * pd - kz) // st + 1
    Wo = (W + 2 * pd - kz) // st + 1
    HW = Ho * Wo
    Hp, Wp = H + 2 * pd, W + 2 * pd
    K = kz * kz * Cin

    # Cout tiling: no padding at all when Cout <= 128 (the lane-dense dim is HW).
    if Cout <= 128:
        CTC, Cout_pad = Cout, Cout
    else:
        CTC = 128
        Cout_pad = pl.cdiv(Cout, CTC) * CTC

    # Single input layout pass (one fused transpose+pad copy); output needs none.
    x_pad = jnp.pad(jnp.transpose(x_nchw, (0, 2, 3, 1)),
                    ((0, 0), (pd, pd), (pd, pd), (0, 0)))

    # Weights: (Cout, Cin, kz, kz) -> (Cout_pad, K) with K ordered (dy, dx, cin).
    w2 = jnp.transpose(weight, (0, 2, 3, 1)).reshape(Cout, K)
    if Cout_pad != Cout:
        w2 = jnp.pad(w2, ((0, Cout_pad - Cout), (0, 0)))

    kernel = functools.partial(_basicblock_kernel,
                               kz=kz, st=st, Ho=Ho, Wo=Wo, Cin=Cin)

    itemsize = jnp.dtype(x_nchw.dtype).itemsize
    cost = pl.CostEstimate(
        flops=2 * N * HW * K * Cout_pad,
        transcendentals=N * Cout_pad,
        bytes_accessed=(N * Hp * Wp * Cin + Cout_pad * K + N * Cout_pad * HW)
        * itemsize,
    )

    out = pl.pallas_call(
        kernel,
        out_shape=jax.ShapeDtypeStruct((N, Cout_pad, HW), x_nchw.dtype),
        grid_spec=pltpu.PrefetchScalarGridSpec(
            num_scalar_prefetch=0,
            grid=(N, Cout_pad // CTC),
            in_specs=[
                pl.BlockSpec((pl.Squeezed(), Hp, Wp, Cin),
                             lambda n, c: (n, 0, 0, 0)),
                pl.BlockSpec((CTC, K),
                             lambda n, c: (c, 0)),
            ],
            out_specs=pl.BlockSpec((pl.Squeezed(), CTC, HW),
                                   lambda n, c: (n, c, 0)),
            scratch_shapes=[pltpu.VMEM((HW, K), x_nchw.dtype)],
        ),
        compiler_params=pltpu.CompilerParams(
            dimension_semantics=("parallel", "parallel"),
            vmem_limit_bytes=32 * 1024 * 1024),
        cost_estimate=cost,
    )(x_pad, w2)

    if Cout_pad != Cout:
        out = out[:, :Cout, :]
    # Channel-major kernel output -> NCHW is a pure reshape (no HBM transpose pass).
    return out.reshape(N, Cout, Ho, Wo)


def _reference(x_nchw, weight, bias, kz, st, pd):
    """Pure-JAX reference (lax conv + bias + instance norm + leaky relu)."""
    y = jax.lax.conv_general_dilated(
        x_nchw, weight,
        window_strides=(st, st),
        padding=((pd, pd), (pd, pd)),
        dimension_numbers=("NCHW", "OIHW", "NCHW"),
    ) + bias.reshape(1, -1, 1, 1)
    mean = jnp.mean(y, axis=(2, 3), keepdims=True)
    var = jnp.mean((y - mean) ** 2, axis=(2, 3), keepdims=True)
    yn = (y - mean) * jax.lax.rsqrt(var + EPS)
    return jnp.where(yn >= 0, yn, NEG_SLOPE * yn)


if __name__ == "__main__":
    # Small shapes consistent with the module: basicblock(4, 8, kz=3, st=1, pd=1)
    N, Cin, H, W = 2, 4, 16, 16
    Cout, kz, st, pd = 8, 3, 1, 1

    key = jax.random.PRNGKey(0)
    kx, kw, kb = jax.random.split(key, 3)
    x = jax.random.normal(kx, (N, Cin, H, W), dtype=jnp.float32)
    weight = 0.1 * jax.random.normal(kw, (Cout, Cin, kz, kz), dtype=jnp.float32)
    bias = 0.1 * jax.random.normal(kb, (Cout,), dtype=jnp.float32)

    out = basicblock_forward(x, weight, bias, kz=kz, st=st, pd=pd)
    out = jax.block_until_ready(out)

    ref = _reference(x, weight, bias, kz, st, pd)
    assert out.shape == (N, Cout, H, W)
    assert jnp.allclose(out, ref, atol=1e-4, rtol=1e-4)

    print("KERNEL_OK")
</pallas_src>

<mosaic_0001>
module attributes {stable_mosaic.version = 11 : i64} {
  func.func @_basicblock_kernel(%arg0: i32, %arg1: i32, %arg2: memref<1x18x18x4xf32, #tpu.memory_space<vmem>>, %arg3: memref<8x36xf32, #tpu.memory_space<vmem>>, %arg4: memref<1x8x256xf32, #tpu.memory_space<vmem>>, %arg5: memref<256x36xf32, #tpu.memory_space<vmem>>) attributes {dimension_semantics = [#tpu.dimension_semantics<parallel>, #tpu.dimension_semantics<parallel>], iteration_bounds = array<i64: 2, 1>, scalar_prefetch = 0 : i64, scratch_operands = 1 : i64, tpu.core_type = #tpu.core_type<tc>, window_params = [{transform_indices = @transform_0, window_bounds = array<i64: 1, 18, 18, 4>}, {transform_indices = @transform_1, window_bounds = array<i64: 8, 36>}, {transform_indices = @transform_2, window_bounds = array<i64: 1, 8, 256>}]} {
    %c0 = arith.constant 0 : index
    %c0_0 = arith.constant 0 : index
    %c0_1 = arith.constant 0 : index
    %c0_2 = arith.constant 0 : index
    %0 = vector.load %arg2[%c0, %c0_0, %c0_1, %c0_2] : memref<1x18x18x4xf32, #tpu.memory_space<vmem>>, vector<1x16x16x4xf32>
    %1 = vector.shape_cast %0 : vector<1x16x16x4xf32> to vector<16x16x4xf32>
    %2 = vector.shape_cast %1 : vector<16x16x4xf32> to vector<256x4xf32>
    %c0_3 = arith.constant 0 : index
    %c0_4 = arith.constant 0 : index
    %3 = vector.load %arg5[%c0_3, %c0_4] : memref<256x36xf32, #tpu.memory_space<vmem>>, vector<256x4xf32>
    tpu.vector_store %arg5[%c0_3, %c0_4], %2 {strides = array<i32>} : memref<256x36xf32, #tpu.memory_space<vmem>>, vector<256x4xf32>,
    %c0_5 = arith.constant 0 : index
    %c0_6 = arith.constant 0 : index
    %c1 = arith.constant 1 : index
    %c0_7 = arith.constant 0 : index
    %4 = vector.load %arg2[%c0_5, %c0_6, %c1, %c0_7] : memref<1x18x18x4xf32, #tpu.memory_space<vmem>>, vector<1x16x16x4xf32>
    %5 = vector.shape_cast %4 : vector<1x16x16x4xf32> to vector<16x16x4xf32>
    %6 = vector.shape_cast %5 : vector<16x16x4xf32> to vector<256x4xf32>
    %c0_8 = arith.constant 0 : index
    %c4 = arith.constant 4 : index
    %7 = vector.load %arg5[%c0_8, %c4] : memref<256x36xf32, #tpu.memory_space<vmem>>, vector<256x4xf32>
    tpu.vector_store %arg5[%c0_8, %c4], %6 {strides = array<i32>} : memref<256x36xf32, #tpu.memory_space<vmem>>, vector<256x4xf32>,
    %c0_9 = arith.constant 0 : index
    %c0_10 = arith.constant 0 : index
    %c2 = arith.constant 2 : index
    %c0_11 = arith.constant 0 : index
    %8 = vector.load %arg2[%c0_9, %c0_10, %c2, %c0_11] : memref<1x18x18x4xf32, #tpu.memory_space<vmem>>, vector<1x16x16x4xf32>
    %9 = vector.shape_cast %8 : vector<1x16x16x4xf32> to vector<16x16x4xf32>
    %10 = vector.shape_cast %9 : vector<16x16x4xf32> to vector<256x4xf32>
    %c0_12 = arith.constant 0 : index
    %c8 = arith.constant 8 : index
    %11 = vector.load %arg5[%c0_12, %c8] : memref<256x36xf32, #tpu.memory_space<vmem>>, vector<256x4xf32>
    tpu.vector_store %arg5[%c0_12, %c8], %10 {strides = array<i32>} : memref<256x36xf32, #tpu.memory_space<vmem>>, vector<256x4xf32>,
    %c0_13 = arith.constant 0 : index
    %c1_14 = arith.constant 1 : index
    %c0_15 = arith.constant 0 : index
    %c0_16 = arith.constant 0 : index
    %12 = vector.load %arg2[%c0_13, %c1_14, %c0_15, %c0_16] : memref<1x18x18x4xf32, #tpu.memory_space<vmem>>, vector<1x16x16x4xf32>
    %13 = vector.shape_cast %12 : vector<1x16x16x4xf32> to vector<16x16x4xf32>
    %14 = vector.shape_cast %13 : vector<16x16x4xf32> to vector<256x4xf32>
    %c0_17 = arith.constant 0 : index
    %c12 = arith.constant 12 : index
    %15 = vector.load %arg5[%c0_17, %c12] : memref<256x36xf32, #tpu.memory_space<vmem>>, vector<256x4xf32>
    tpu.vector_store %arg5[%c0_17, %c12], %14 {strides = array<i32>} : memref<256x36xf32, #tpu.memory_space<vmem>>, vector<256x4xf32>,
    %c0_18 = arith.constant 0 : index
    %c1_19 = arith.constant 1 : index
    %c1_20 = arith.constant 1 : index
    %c0_21 = arith.constant 0 : index
    %16 = vector.load %arg2[%c0_18, %c1_19, %c1_20, %c0_21] : memref<1x18x18x4xf32, #tpu.memory_space<vmem>>, vector<1x16x16x4xf32>
    %17 = vector.shape_cast %16 : vector<1x16x16x4xf32> to vector<16x16x4xf32>
    %18 = vector.shape_cast %17 : vector<16x16x4xf32> to vector<256x4xf32>
    %c0_22 = arith.constant 0 : index
    %c16 = arith.constant 16 : index
    %19 = vector.load %arg5[%c0_22, %c16] : memref<256x36xf32, #tpu.memory_space<vmem>>, vector<256x4xf32>
    tpu.vector_store %arg5[%c0_22, %c16], %18 {strides = array<i32>} : memref<256x36xf32, #tpu.memory_space<vmem>>, vector<256x4xf32>,
    %c0_23 = arith.constant 0 : index
    %c1_24 = arith.constant 1 : index
    %c2_25 = arith.constant 2 : index
    %c0_26 = arith.constant 0 : index
    %20 = vector.load %arg2[%c0_23, %c1_24, %c2_25, %c0_26] : memref<1x18x18x4xf32, #tpu.memory_space<vmem>>, vector<1x16x16x4xf32>
    %21 = vector.shape_cast %20 : vector<1x16x16x4xf32> to vector<16x16x4xf32>
    %22 = vector.shape_cast %21 : vector<16x16x4xf32> to vector<256x4xf32>
    %c0_27 = arith.constant 0 : index
    %c20 = arith.constant 20 : index
    %23 = vector.load %arg5[%c0_27, %c20] : memref<256x36xf32, #tpu.memory_space<vmem>>, vector<256x4xf32>
    tpu.vector_store %arg5[%c0_27, %c20], %22 {strides = array<i32>} : memref<256x36xf32, #tpu.memory_space<vmem>>, vector<256x4xf32>,
    %c0_28 = arith.constant 0 : index
    %c2_29 = arith.constant 2 : index
    %c0_30 = arith.constant 0 : index
    %c0_31 = arith.constant 0 : index
    %24 = vector.load %arg2[%c0_28, %c2_29, %c0_30, %c0_31] : memref<1x18x18x4xf32, #tpu.memory_space<vmem>>, vector<1x16x16x4xf32>
    %25 = vector.shape_cast %24 : vector<1x16x16x4xf32> to vector<16x16x4xf32>
    %26 = vector.shape_cast %25 : vector<16x16x4xf32> to vector<256x4xf32>
    %c0_32 = arith.constant 0 : index
    %c24 = arith.constant 24 : index
    %27 = vector.load %arg5[%c0_32, %c24] : memref<256x36xf32, #tpu.memory_space<vmem>>, vector<256x4xf32>
    tpu.vector_store %arg5[%c0_32, %c24], %26 {strides = array<i32>} : memref<256x36xf32, #tpu.memory_space<vmem>>, vector<256x4xf32>,
    %c0_33 = arith.constant 0 : index
    %c2_34 = arith.constant 2 : index
    %c1_35 = arith.constant 1 : index
    %c0_36 = arith.constant 0 : index
    %28 = vector.load %arg2[%c0_33, %c2_34, %c1_35, %c0_36] : memref<1x18x18x4xf32, #tpu.memory_space<vmem>>, vector<1x16x16x4xf32>
    %29 = vector.shape_cast %28 : vector<1x16x16x4xf32> to vector<16x16x4xf32>
    %30 = vector.shape_cast %29 : vector<16x16x4xf32> to vector<256x4xf32>
    %c0_37 = arith.constant 0 : index
    %c28 = arith.constant 28 : index
    %31 = vector.load %arg5[%c0_37, %c28] : memref<256x36xf32, #tpu.memory_space<vmem>>, vector<256x4xf32>
    tpu.vector_store %arg5[%c0_37, %c28], %30 {strides = array<i32>} : memref<256x36xf32, #tpu.memory_space<vmem>>, vector<256x4xf32>,
    %c0_38 = arith.constant 0 : index
    %c2_39 = arith.constant 2 : index
    %c2_40 = arith.constant 2 : index
    %c0_41 = arith.constant 0 : index
    %32 = vector.load %arg2[%c0_38, %c2_39, %c2_40, %c0_41] : memref<1x18x18x4xf32, #tpu.memory_space<vmem>>, vector<1x16x16x4xf32>
    %33 = vector.shape_cast %32 : vector<1x16x16x4xf32> to vector<16x16x4xf32>
    %34 = vector.shape_cast %33 : vector<16x16x4xf32> to vector<256x4xf32>
    %c0_42 = arith.constant 0 : index
    %c32 = arith.constant 32 : index
    %35 = vector.load %arg5[%c0_42, %c32] : memref<256x36xf32, #tpu.memory_space<vmem>>, vector<256x4xf32>
    tpu.vector_store %arg5[%c0_42, %c32], %34 {strides = array<i32>} : memref<256x36xf32, #tpu.memory_space<vmem>>, vector<256x4xf32>,
    %c0_43 = arith.constant 0 : index
    %c0_44 = arith.constant 0 : index
    %36 = vector.load %arg3[%c0_43, %c0_44] : memref<8x36xf32, #tpu.memory_space<vmem>>, vector<8x36xf32>
    %c0_45 = arith.constant 0 : index
    %c0_46 = arith.constant 0 : index
    %37 = vector.load %arg5[%c0_45, %c0_46] : memref<256x36xf32, #tpu.memory_space<vmem>>, vector<256x36xf32>
    %38 = tpu.transpose %37, [1, 0] : vector<256x36xf32> -> vector<36x256xf32>
    %cst = arith.constant dense<0.000000e+00> : vector<8x256xf32>
    %39 = tpu.matmul %36, %38, %cst {dimension_numbers = #tpu.dot_dimension_numbers<[1], [0], [0], [1], [0, 0, 1, 1], [], []>} : vector<8x36xf32>, vector<36x256xf32>, vector<8x256xf32> -> vector<8x256xf32>
    %cst_47 = arith.constant dense<0.000000e+00> : vector<8xf32>
    %40 = vector.multi_reduction <add>, %39, %cst_47 [1] : vector<8x256xf32> to vector<8xf32>
    %41 = vector.shape_cast %40 : vector<8xf32> to vector<8x1xf32>
    %cst_48 = arith.constant 2.560000e+02 : f32
    %42 = vector.broadcast %cst_48 : f32 to vector<8x1xf32>
    %43 = arith.divf %41, %42 : vector<8x1xf32>
    %44 = vector.broadcast %43 : vector<8x1xf32> to vector<8x256xf32>
    %45 = arith.subf %39, %44 : vector<8x256xf32>
    %46 = arith.mulf %45, %45 : vector<8x256xf32>
    %cst_49 = arith.constant dense<0.000000e+00> : vector<8xf32>
    %47 = vector.multi_reduction <add>, %46, %cst_49 [1] : vector<8x256xf32> to vector<8xf32>
    %48 = vector.shape_cast %47 : vector<8xf32> to vector<8x1xf32>
    %cst_50 = arith.constant 2.560000e+02 : f32
    %49 = vector.broadcast %cst_50 : f32 to vector<8x1xf32>
    %50 = arith.divf %48, %49 : vector<8x1xf32>
    %cst_51 = arith.constant 9.99999974E-6 : f32
    %51 = vector.broadcast %cst_51 : f32 to vector<8x1xf32>
    %52 = arith.addf %50, %51 : vector<8x1xf32>
    %53 = math.rsqrt %52 : vector<8x1xf32>
    %54 = vector.broadcast %53 : vector<8x1xf32> to vector<8x256xf32>
    %55 = arith.mulf %45, %54 : vector<8x256xf32>
    %cst_52 = arith.constant 2.000000e-01 : f32
    %56 = vector.broadcast %cst_52 : f32 to vector<8x256xf32>
    %57 = arith.mulf %56, %55 : vector<8x256xf32>
    %58 = arith.maximumf %55, %57 : vector<8x256xf32>
    %c0_53 = arith.constant 0 : index
    %c0_54 = arith.constant 0 : index
    %c0_55 = arith.constant 0 : index
    %59 = vector.load %arg4[%c0_53, %c0_54, %c0_55] : memref<1x8x256xf32, #tpu.memory_space<vmem>>, vector<1x8x256xf32>
    %60 = vector.shape_cast %59 : vector<1x8x256xf32> to vector<8x256xf32>
    %61 = vector.shape_cast %58 : vector<8x256xf32> to vector<1x8x256xf32>
    tpu.vector_store %arg4[%c0_53, %c0_54, %c0_55], %61 {strides = array<i32>} : memref<1x8x256xf32, #tpu.memory_space<vmem>>, vector<1x8x256xf32>,
    return
  }
  func.func @transform_0(%arg0: i32, %arg1: i32) -> (i32, i32, i32, i32) {
    %c0_i32 = arith.constant 0 : i32
    %c0_i32_0 = arith.constant 0 : i32
    %c0_i32_1 = arith.constant 0 : i32
    %c0_i32_2 = arith.constant 0 : i32
    return %arg0, %c0_i32, %c0_i32_0, %c0_i32_1 : i32, i32, i32, i32
  }
  func.func @transform_1(%arg0: i32, %arg1: i32) -> (i32, i32) {
    %c0_i32 = arith.constant 0 : i32
    %c0_i32_0 = arith.constant 0 : i32
    return %arg1, %c0_i32 : i32, i32
  }
  func.func @transform_2(%arg0: i32, %arg1: i32) -> (i32, i32, i32) {
    %c0_i32 = arith.constant 0 : i32
    %c0_i32_0 = arith.constant 0 : i32
    return %arg0, %arg1, %c0_i32 : i32, i32, i32
  }
}

</mosaic_0001>

<bundles_post_ra>
// kernel: basicblock_forward.1
= control target key start
LH: loop header
LB: loop body
LE: loop exit
PB: predicated region body
PF: predicated region fallthrough
CT: control target
= control target key end

     0   :  { %s2428_s9 = smov 0   ;;  %s2430_s10 = smov 0   ;;  %s3624_s0 = inlined_call_operand.vmem [shape: f32[2,18,18,4], index: 0, kind: input, shape index: {}]   ;;  %s3625_s1 = inlined_call_operand.vmem [shape: f32[8,36], index: 1, kind: input, shape index: {}]   ;;  %s3626_s2 = inlined_call_operand.vmem [shape: f32[2,8,256], index: 2, kind: output, shape index: {}]  }
   0x1   :  { %s2432_s11 = smov 0  }
   0x2 LB: > { %s24_s12 = sadd.s32 1, %s2398_s10  ;;  %p2109_p0 = scmp.ge.s32.totalorder %s2402_s11, 1  ;;  %s2402_s11 = sphi %s2432_s11, %s12_s11   ;;  %s2398_s10 = sphi %s2430_s10, %s3696_s10   ;;  %s2394_s9 = sphi %s2428_s9, %s3695_s9  }
   0x3   : > { %p26_p1 = scmp.ge.s32.totalorder %s24_s12, 2  ;;  %p135_p2 = scmp.lt.s32.totalorder %s2402_s11, 3 }
   0x5   : > { %s3698_s12 = smov (%p26_p1, %s24_s12), 0  ;;  %p136_p3 = pnand %p2109_p0, %p135_p2 }
   0x7   : > { %139 = sbr.rel (%p136_p3) target bundleno = 1223 (0x4c7), region = 28 }
   0xc   : > { %p165_p4 = scmp.lt.s32.totalorder %s2394_s9, 1  ;;  %s2404_s17 = smov 4   ;;  %vm215_vm0 = vcmask 31744   ;;  %vm408_vm1 = vcmask 64544   ;;  %vm601_vm2 = vcmask 97344   ;;  %vm795_vm3 = vcmask 130144  }
   0xd   : > { %s2405_s18 = smov 8   ;;  %s2406_s19 = smov 12   ;;  %vm988_vm4 = vcmask 162944   ;;  %vm1181_vm5 = vcmask 195744   ;;  %vm1375_vm6 = vcmask 228544   ;;  %vm1568_vm7 = vcmask 261344  }
   0xe   : > { %s3700_s9 = smov (!%p165_p4, %s2394_s9), 1  ;;  %s2407_s20 = smov 16   ;;  %vm1761_vm8 = vcmask 294144   ;;  %vm1827_vm9 = vcmask 293888  }
   0xf   : > { %s2342_s13 = smul.u32 432, %s3700_s9  ;;  %s2408_s21 = smov 20  }
  0x10   : > { %s2409_s22 = smov 24   ;;  %s2410_s23 = smov 28  }
  0x11   : > { %s2452_s16 = scalar_lea.vmem %s3624_s0, %s2342_s13  ;;  %s2411_s24 = smov 32  }
  0x12   : > { %v248_v0 = vld [vmem:[%s2452_s16 + $0x1] sm:$0xff]  ;;  %v2456_v1 = vld [vmem:[%s2452_s16 + $0x19] sm:$0xff]  ;;  %v2462_v2 = vld [vmem:[%s2452_s16 + $0x31] sm:$0xff]  ;;  %s2341_s27 = sshll.u32 %s3700_s9, 4 }
  0x13   : > { %312 = vrot.lane.b32.xlu0 %v248_v0, %s2404_s17  ;;  %316 = vrot.lane.b32.xlu1 %v2456_v1, %s2404_s17  ;;  %v249_v3 = vld [vmem:[%s2452_s16 + $0x9] sm:$0xff]  ;;  %v2468_v4 = vld [vmem:[%s2452_s16 + $0x21] sm:$0xff]  ;;  %s182_s30 = scalar_lea.vmem %s3626_s2, %s2341_s27 }
  0x14   : > { %320 = vrot.lane.b32.xlu2 %v2462_v2, %s2404_s17  ;;  %v2474_v5 = vld [vmem:[%s2452_s16 + $0x39] sm:$0xff]  ;;  %v2479_v6 = vld [vmem:[%s2452_s16 + $0x49] sm:$0xff]  ;;  %v2482_v7 = vld [vmem:[%s2452_s16 + $0x51] sm:$0xff] }
  0x15   : > { %v2489_v8 = vld [vmem:[%s2452_s16 + $0x61] sm:$0xff]  ;;  %v2494_v9 = vld [vmem:[%s2452_s16 + $0x69] sm:$0xff]  ;;  %v2497_v10 = vld [vmem:[%s2452_s16 + $0x79] sm:$0xff] }
  0x16   : > { %v2504_v11 = vld [vmem:[%s2452_s16 + $0x81] sm:$0xff]  ;;  %v2509_v12 = vld [vmem:[%s2452_s16 + $0x91] sm:$0xff]  ;;  %v2512_v13 = vld [vmem:[%s2452_s16 + $0x99] sm:$0xff] }
  0x17   : > { %v2519_v14 = vld [vmem:[%s2452_s16 + $0xa9] sm:$0xff]  ;;  %v2524_v15 = vld [vmem:[%s2452_s16 + $0xb1] sm:$0xff]  ;;  %v2527_v16 = vld [vmem:[%s2452_s16 + $0xc1] sm:$0xff] }
  0x18   : > { %v2534_v17 = vld [vmem:[%s2452_s16 + $0xc9] sm:$0xff]  ;;  %v2539_v18 = vld [vmem:[%s2452_s16 + $0xd9] sm:$0xff]  ;;  %v2542_v19 = vld [vmem:[%s2452_s16 + $0xe1] sm:$0xff] }
  0x19   : > { %v2549_v20 = vld [vmem:[%s2452_s16 + $0xf1] sm:$0xff]  ;;  %v2554_v21 = vld [vmem:[%s2452_s16 + $0xf9] sm:$0xff]  ;;  %v2557_v22 = vld [vmem:[%s2452_s16 + $0x109] sm:$0xff] }
  0x1a   : > { %v2564_v23 = vld [vmem:[%s2452_s16 + $0x111] sm:$0xff]  ;;  %v2569_v24 = vld [vmem:[%s2452_s16 + $0x121] sm:$0xff]  ;;  %v2572_v25 = vld [vmem:[%s2452_s16 + $0x129] sm:$0xff] }
  0x1b   : > { %314 = vrot.lane.b32.xlu0 %v249_v3, %s2404_s17  ;;  %318 = vrot.lane.b32.xlu1 %v2468_v4, %s2404_s17  ;;  %v2579_v26 = vld [vmem:[%s2452_s16 + $0x139] sm:$0xff]  ;;  %v2584_v27 = vld [vmem:[%s2452_s16 + $0x141] sm:$0xff] }
  0x1c   : > { %322 = vrot.lane.b32.xlu2 %v2474_v5, %s2404_s17  ;;  %v2587_v28 = vld [vmem:[%s2452_s16 + $0x151] sm:$0xff]  ;;  %v2594_v29 = vld [vmem:[%s2452_s16 + $0x159] sm:$0xff]  ;;  %v2599_v30 = vld [vmem:[%s2452_s16 + $0x169] sm:$0xff] }
  0x1d   : > { %v2602_v31 = vld [vmem:[%s2452_s16 + $0x171] sm:$0xff]  ;;  %v441_v32 = vld [vmem:[%s2452_s16 + $0x2] sm:$0xff]  ;;  %v2614_v35 = vld [vmem:[%s2452_s16 + $0x1a] sm:$0xff] }
  0x1e   : > { %v183_v33 = vld [vmem:[%s2452_s16] sm:$0xff]  ;;  %v442_v34 = vld [vmem:[%s2452_s16 + $0xa] sm:$0xff]  ;;  %3651 = vst [vmem:[#allocation3_spill] sm:$0xff] %v2614_v35  ;;  %v2623_v37 = vld [vmem:[%s2452_s16 + $0x18] sm:$0xff] }
  0x1f   : > { %216 = vst.msk [vmem:[#allocation2] sm:$0xff] %vm215_vm0, %v183_v33  ;;  %v2617_v36 = vld [vmem:[%s2452_s16 + $0x22] sm:$0xff]  ;;  %v2626_v38 = vld [vmem:[%s2452_s16 + $0x30] sm:$0xff]  ;;  %v2640_v41 = vld [vmem:[%s2452_s16 + $0x3a] sm:$0xff] }
  0x20   : > { %3652 = vst [vmem:[#allocation4_spill] sm:$0xff] %v2617_v36  ;;  %v184_v39 = vld [vmem:[%s2452_s16 + $0x8] sm:$0xff]  ;;  %v2637_v40 = vld [vmem:[%s2452_s16 + $0x32] sm:$0xff]  ;;  %v2651_v44 = vld [vmem:[%s2452_s16 + $0x20] sm:$0xff] }
  0x21   : > { %218 = vst.msk [vmem:[#allocation2 + $0x10] sm:$0xff] %vm215_vm0, %v2623_v37  ;;  %v2644_v43 = vld [vmem:[%s2452_s16 + $0x4a] sm:$0xff]  ;;  %v2654_v45 = vld [vmem:[%s2452_s16 + $0x38] sm:$0xff]  ;;  %v2671_v48 = vld [vmem:[%s2452_s16 + $0x62] sm:$0xff] }
  0x22   : > { %220 = vst.msk [vmem:[#allocation2 + $0x20] sm:$0xff] %vm215_vm0, %v2626_v38  ;;  %v2659_v46 = vld [vmem:[%s2452_s16 + $0x48] sm:$0xff]  ;;  %v2668_v47 = vld [vmem:[%s2452_s16 + $0x52] sm:$0xff]  ;;  %v2685_v52 = vld [vmem:[%s2452_s16 + $0x60] sm:$0xff] }
  0x23   : > { %324 = vrot.lane.b32.xlu0 %v2479_v6, %s2404_s17  ;;  %326 = vrot.lane.b32.xlu1 %v2482_v7, %s2404_s17  ;;  %217 = vst.msk [vmem:[#allocation2 + $0x8] sm:$0xff] %vm215_vm0, %v184_v39  ;;  %v2675_v50 = vld [vmem:[%s2452_s16 + $0x6a] sm:$0xff]  ;;  %v2699_v54 = vld [vmem:[%s2452_s16 + $0x7a] sm:$0xff] }
  0x24   : > { %328 = vrot.lane.b32.xlu2 %v2489_v8, %s2404_s17  ;;  %3653 = vst [vmem:[#allocation5_spill] sm:$0xff] %v2637_v40  ;;  %v2682_v51 = vld [vmem:[%s2452_s16 + $0x50] sm:$0xff]  ;;  %v2690_v53 = vld [vmem:[%s2452_s16 + $0x68] sm:$0xff]  ;;  %v2713_v58 = vld [vmem:[%s2452_s16 + $0x78] sm:$0xff] }
  0x25   : > { %3654 = vst [vmem:[#allocation6_spill] sm:$0xff] %v2640_v41  ;;  %v2702_v55 = vld [vmem:[%s2452_s16 + $0x82] sm:$0xff]  ;;  %v2706_v57 = vld [vmem:[%s2452_s16 + $0x92] sm:$0xff]  ;;  %v2730_v63 = vld [vmem:[%s2452_s16 + $0x9a] sm:$0xff] }
  0x26   : > { %3655 = vst [vmem:[#allocation7_spill] sm:$0xff] %v2644_v43  ;;  %v2716_v59 = vld [vmem:[%s2452_s16 + $0x80] sm:$0xff]  ;;  %v2723_v62 = vld [vmem:[%s2452_s16 + $0x90] sm:$0xff]  ;;  %v2746_v33 = vld [vmem:[%s2452_s16 + $0x98] sm:$0xff] }
  0x27   : > { %219 = vst.msk [vmem:[#allocation2 + $0x18] sm:$0xff] %vm215_vm0, %v2651_v44  ;;  %v2733_v0 = vld [vmem:[%s2452_s16 + $0xaa] sm:$0xff] }
  0x28   : > { %221 = vst.msk [vmem:[#allocation2 + $0x28] sm:$0xff] %vm215_vm0, %v2654_v45 }
  0x29   : > { %222 = vst.msk [vmem:[#allocation2 + $0x30] sm:$0xff] %vm215_vm0, %v2659_v46 }
  0x2a   : > { %3656 = vst [vmem:[#allocation8_spill] sm:$0xff] %v2668_v47 }
  0x2b   : > { %330 = vrot.lane.b32.xlu0 %v2494_v9, %s2404_s17  ;;  %332 = vrot.lane.b32.xlu1 %v2497_v10, %s2404_s17  ;;  %3657 = vst [vmem:[#allocation9_spill] sm:$0xff] %v2671_v48 }
  0x2c   : > { %334 = vrot.lane.b32.xlu2 %v2504_v11, %s2404_s17  ;;  %3658 = vst [vmem:[#allocation10_spill] sm:$0xff] %v2675_v50 }
  0x2d   : > { %223 = vst.msk [vmem:[#allocation2 + $0x38] sm:$0xff] %vm215_vm0, %v2682_v51 }
  0x2e   : > { %224 = vst.msk [vmem:[#allocation2 + $0x40] sm:$0xff] %vm215_vm0, %v2685_v52 }
  0x2f   : > { %225 = vst.msk [vmem:[#allocation2 + $0x48] sm:$0xff] %vm215_vm0, %v2690_v53 }
  0x30   : > { %3659 = vst [vmem:[#allocation11_spill] sm:$0xff] %v2699_v54 }
  0x31   : > { %3660 = vst [vmem:[#allocation12_spill] sm:$0xff] %v2702_v55 }
  0x32   : > { %3661 = vst [vmem:[#allocation13_spill] sm:$0xff] %v2706_v57 }
  0x33   : > { %336 = vrot.lane.b32.xlu0 %v2509_v12, %s2404_s17  ;;  %338 = vrot.lane.b32.xlu1 %v2512_v13, %s2404_s17  ;;  %226 = vst.msk [vmem:[#allocation2 + $0x50] sm:$0xff] %vm215_vm0, %v2713_v58 }
  0x34   : > { %340 = vrot.lane.b32.xlu2 %v2519_v14, %s2404_s17  ;;  %227 = vst.msk [vmem:[#allocation2 + $0x58] sm:$0xff] %vm215_vm0, %v2716_v59 }
  0x35   : > { %3662 = vst [vmem:[#allocation14_spill] sm:$0xff] %v2730_v63 }
  0x36   : > { %3663 = vst [vmem:[#allocation15_spill] sm:$0xff] %v2733_v0 }
  0x37   : > { %228 = vst.msk [vmem:[#allocation2 + $0x60] sm:$0xff] %vm215_vm0, %v2723_v62 }
  0x38   : > { %229 = vst.msk [vmem:[#allocation2 + $0x68] sm:$0xff] %vm215_vm0, %v2746_v33 }
  0x3b   : > { %342 = vrot.lane.b32.xlu0 %v2524_v15, %s2404_s17  ;;  %344 = vrot.lane.b32.xlu1 %v2527_v16, %s2404_s17 }
  0x3c   : > { %346 = vrot.lane.b32.xlu2 %v2534_v17, %s2404_s17 }
  0x43   : > { %348 = vrot.lane.b32.xlu0 %v2539_v18, %s2404_s17  ;;  %350 = vrot.lane.b32.xlu1 %v2542_v19, %s2404_s17 }
  0x44   : > { %352 = vrot.lane.b32.xlu2 %v2549_v20, %s2404_s17 }
  0x4b   : > { %354 = vrot.lane.b32.xlu0 %v2554_v21, %s2404_s17  ;;  %356 = vrot.lane.b32.xlu1 %v2557_v22, %s2404_s17 }
  0x4c   : > { %358 = vrot.lane.b32.xlu2 %v2564_v23, %s2404_s17 }
  0x53   : > { %360 = vrot.lane.b32.xlu0 %v2569_v24, %s2404_s17  ;;  %362 = vrot.lane.b32.xlu1 %v2572_v25, %s2404_s17 }
  0x54   : > { %364 = vrot.lane.b32.xlu2 %v2579_v26, %s2404_s17 }
  0x5b   : > { %366 = vrot.lane.b32.xlu0 %v2584_v27, %s2404_s17  ;;  %368 = vrot.lane.b32.xlu1 %v2587_v28, %s2404_s17 }
  0x5c   : > { %370 = vrot.lane.b32.xlu2 %v2594_v29, %s2404_s17 }
  0x63   : > { %372 = vrot.lane.b32.xlu0 %v2599_v30, %s2404_s17  ;;  %374 = vrot.lane.b32.xlu1 %v2602_v31, %s2404_s17 }
  0x64   : > { %505 = vrot.lane.b32.xlu2 %v441_v32, %s2405_s18  ;;  %v2739_v32 = vld [vmem:[%s2452_s16 + $0xb2] sm:$0xff] }
  0x65   : > { %3664 = vst [vmem:[#allocation16_spill] sm:$0xff] %v2739_v32 }
  0x6b   : > { %507 = vrot.lane.b32.xlu0 %v442_v34, %s2405_s18  ;;  %509 = vrot.lane.b32.xlu1 %v2614_v35, %s2405_s18  ;;  %v2749_v34 = vld [vmem:[%s2452_s16 + $0xa8] sm:$0xff] }
  0x6c   : > { %511 = vrot.lane.b32.xlu2 %v2617_v36, %s2405_s18  ;;  %230 = vst.msk [vmem:[#allocation2 + $0x70] sm:$0xff] %vm215_vm0, %v2749_v34  ;;  %v2881_v36 = vld [vmem:[%s2452_s16 + $0x16a] sm:$0xff] }
  0x6d   : > { %3671 = vst [vmem:[#allocation23_spill] sm:$0xff] %v2881_v36 }
  0x6e   : > { %v321_v42 = vpop.permute.xlu2 %320 }
  0x6f   : > { %413 = vst.msk [vmem:[#allocation2 + $0x20] sm:$0xff] %vm408_vm1, %v321_v42 }
  0x73   : > { %513 = vrot.lane.b32.xlu0 %v2637_v40, %s2405_s18  ;;  %515 = vrot.lane.b32.xlu1 %v2640_v41, %s2405_s18 }
  0x74   : > { %517 = vrot.lane.b32.xlu2 %v2644_v43, %s2405_s18  ;;  %v2852_v43 = vld [vmem:[%s2452_s16 + $0x142] sm:$0xff] }
  0x75   : > { %3669 = vst [vmem:[#allocation21_spill] sm:$0xff] %v2852_v43 }
  0x76   : > { %v323_v49 = vpop.permute.xlu2 %322 }
  0x77   : > { %414 = vst.msk [vmem:[#allocation2 + $0x28] sm:$0xff] %vm408_vm1, %v323_v49  ;;  %v2756_v49 = vld [vmem:[%s2452_s16 + $0xb0] sm:$0xff] }
  0x78   : > { %231 = vst.msk [vmem:[#allocation2 + $0x78] sm:$0xff] %vm215_vm0, %v2756_v49 }
  0x7b   : > { %519 = vrot.lane.b32.xlu0 %v2668_v47, %s2405_s18  ;;  %521 = vrot.lane.b32.xlu1 %v2671_v48, %s2405_s18 }
  0x7c   : > { %523 = vrot.lane.b32.xlu2 %v2675_v50, %s2405_s18  ;;  %v465_v50 = vld [vmem:[%s2452_s16 + $0x122] sm:$0xff] }
  0x7e   : > { %v329_v56 = vpop.permute.xlu2 %328 }
  0x7f   : > { %417 = vst.msk [vmem:[#allocation2 + $0x40] sm:$0xff] %vm408_vm1, %v329_v56  ;;  %v2763_v56 = vld [vmem:[%s2452_s16 + $0xc2] sm:$0xff] }
  0x80   : > { %3665 = vst [vmem:[#allocation17_spill] sm:$0xff] %v2763_v56 }
  0x83   : > { %525 = vrot.lane.b32.xlu0 %v2699_v54, %s2405_s18  ;;  %527 = vrot.lane.b32.xlu1 %v2702_v55, %s2405_s18 }
  0x84   : > { %529 = vrot.lane.b32.xlu2 %v2706_v57, %s2405_s18  ;;  %v462_v57 = vld [vmem:[%s2452_s16 + $0xfa] sm:$0xff] }
  0x85   : > { %v313_v60 = vpop.permute.xlu0 %312  ;;  %v317_v61 = vpop.permute.xlu1 %316 }
  0x86   : > { %409 = vst.msk [vmem:[#allocation2] sm:$0xff] %vm408_vm1, %v313_v60  ;;  %v335_v3 = vpop.permute.xlu2 %334  ;;  %v2766_v60 = vld [vmem:[%s2452_s16 + $0xca] sm:$0xff] }
  0x87   : > { %411 = vst.msk [vmem:[#allocation2 + $0x10] sm:$0xff] %vm408_vm1, %v317_v61 }
  0x88   : > { %420 = vst.msk [vmem:[#allocation2 + $0x58] sm:$0xff] %vm408_vm1, %v335_v3  ;;  %v2772_v3 = vld [vmem:[%s2452_s16 + $0xda] sm:$0xff] }
  0x89   : > { %3666 = vst [vmem:[#allocation18_spill] sm:$0xff] %v2766_v60 }
  0x8a   : > { %3667 = vst [vmem:[#allocation19_spill] sm:$0xff] %v2772_v3 }
  0x8b   : > { %531 = vrot.lane.b32.xlu0 %v2730_v63, %s2405_s18  ;;  %533 = vrot.lane.b32.xlu1 %v2733_v0, %s2405_s18  ;;  %v2789_v0 = vld [vmem:[%s2452_s16 + $0xd8] sm:$0xff] }
  0x8c   : > { %535 = vrot.lane.b32.xlu2 %v2739_v32, %s2405_s18  ;;  %234 = vst.msk [vmem:[#allocation2 + $0x90] sm:$0xff] %vm215_vm0, %v2789_v0 }
  0x8d   : > { %v315_v39 = vpop.permute.xlu0 %314  ;;  %v319_v42 = vpop.permute.xlu1 %318 }
  0x8e   : > { %410 = vst.msk [vmem:[#allocation2 + $0x8] sm:$0xff] %vm408_vm1, %v315_v39  ;;  %v341_v61 = vpop.permute.xlu2 %340  ;;  %v2779_v39 = vld [vmem:[%s2452_s16 + $0xc0] sm:$0xff] }
  0x8f   : > { %412 = vst.msk [vmem:[#allocation2 + $0x18] sm:$0xff] %vm408_vm1, %v319_v42  ;;  %v2782_v42 = vld [vmem:[%s2452_s16 + $0xc8] sm:$0xff] }
  0x90   : > { %423 = vst.msk [vmem:[#allocation2 + $0x70] sm:$0xff] %vm408_vm1, %v341_v61 }
  0x91   : > { %232 = vst.msk [vmem:[#allocation2 + $0x80] sm:$0xff] %vm215_vm0, %v2779_v39 }
  0x92   : > { %233 = vst.msk [vmem:[#allocation2 + $0x88] sm:$0xff] %vm215_vm0, %v2782_v42 }
  0x93   : > { %537 = vrot.lane.b32.xlu0 %v2763_v56, %s2405_s18  ;;  %539 = vrot.lane.b32.xlu1 %v2766_v60, %s2405_s18  ;;  %v2796_v60 = vld [vmem:[%s2452_s16 + $0xe2] sm:$0xff]  ;;  %v461_v56 = vld [vmem:[%s2452_s16 + $0xf2] sm:$0xff] }
  0x94   : > { %541 = vrot.lane.b32.xlu2 %v2772_v3, %s2405_s18  ;;  %3668 = vst [vmem:[#allocation20_spill] sm:$0xff] %v2796_v60 }
  0x95   : > { %v325_v32 = vpop.permute.xlu0 %324  ;;  %v327_v61 = vpop.permute.xlu1 %326 }
  0x96   : > { %415 = vst.msk [vmem:[#allocation2 + $0x30] sm:$0xff] %vm408_vm1, %v325_v32  ;;  %v347_v63 = vpop.permute.xlu2 %346  ;;  %v2807_v32 = vld [vmem:[%s2452_s16 + $0xe0] sm:$0xff] }
  0x97   : > { %416 = vst.msk [vmem:[#allocation2 + $0x38] sm:$0xff] %vm408_vm1, %v327_v61  ;;  %v2810_v61 = vld [vmem:[%s2452_s16 + $0xf0] sm:$0xff] }
  0x98   : > { %426 = vst.msk [vmem:[#allocation2 + $0x88] sm:$0xff] %vm408_vm1, %v347_v63  ;;  %v2817_v63 = vld [vmem:[%s2452_s16 + $0xf8] sm:$0xff] }
  0x99   : > { %235 = vst.msk [vmem:[#allocation2 + $0x98] sm:$0xff] %vm215_vm0, %v2807_v32 }
  0x9a   : > { %236 = vst.msk [vmem:[#allocation2 + $0xa0] sm:$0xff] %vm215_vm0, %v2810_v61 }
  0x9b   : > { %543 = vrot.lane.b32.xlu0 %v2796_v60, %s2405_s18  ;;  %545 = vrot.lane.b32.xlu1 %v461_v56, %s2405_s18  ;;  %v463_v56 = vld [vmem:[%s2452_s16 + $0x10a] sm:$0xff]  ;;  %v464_v60 = vld [vmem:[%s2452_s16 + $0x112] sm:$0xff]  ;;  %237 = vst.msk [vmem:[#allocation2 + $0xa8] sm:$0xff] %vm215_vm0, %v2817_v63 }
  0x9c   : > { %547 = vrot.lane.b32.xlu2 %v462_v57, %s2405_s18  ;;  %v2831_v57 = vld [vmem:[%s2452_s16 + $0x108] sm:$0xff] }
  0x9d   : > { %v331_v3 = vpop.permute.xlu0 %330  ;;  %v333_v55 = vpop.permute.xlu1 %332  ;;  %238 = vst.msk [vmem:[#allocation2 + $0xb0] sm:$0xff] %vm215_vm0, %v2831_v57 }
  0x9e   : > { %418 = vst.msk [vmem:[#allocation2 + $0x48] sm:$0xff] %vm408_vm1, %v331_v3  ;;  %v353_v54 = vpop.permute.xlu2 %352  ;;  %v2834_v3 = vld [vmem:[%s2452_s16 + $0x110] sm:$0xff] }
  0x9f   : > { %419 = vst.msk [vmem:[#allocation2 + $0x50] sm:$0xff] %vm408_vm1, %v333_v55 }
  0xa0   : > { %429 = vst.msk [vmem:[#allocation2 + $0xa0] sm:$0xff] %vm408_vm1, %v353_v54  ;;  %v2841_v54 = vld [vmem:[%s2452_s16 + $0x120] sm:$0xff] }
  0xa1   : > { %239 = vst.msk [vmem:[#allocation2 + $0xb8] sm:$0xff] %vm215_vm0, %v2834_v3 }
  0xa2   : > { %240 = vst.msk [vmem:[#allocation2 + $0xc0] sm:$0xff] %vm215_vm0, %v2841_v54 }
  0xa3   : > { %549 = vrot.lane.b32.xlu0 %v463_v56, %s2405_s18  ;;  %551 = vrot.lane.b32.xlu1 %v464_v60, %s2405_s18  ;;  %v466_v60 = vld [vmem:[%s2452_s16 + $0x12a] sm:$0xff]  ;;  %v467_v56 = vld [vmem:[%s2452_s16 + $0x13a] sm:$0xff] }
  0xa4   : > { %553 = vrot.lane.b32.xlu2 %v465_v50, %s2405_s18  ;;  %v2857_v50 = vld [vmem:[%s2452_s16 + $0x128] sm:$0xff] }
  0xa5   : > { %v337_v55 = vpop.permute.xlu0 %336  ;;  %v339_v48 = vpop.permute.xlu1 %338  ;;  %241 = vst.msk [vmem:[#allocation2 + $0xc8] sm:$0xff] %vm215_vm0, %v2857_v50 }
  0xa6   : > { %421 = vst.msk [vmem:[#allocation2 + $0x60] sm:$0xff] %vm408_vm1, %v337_v55  ;;  %v359_v47 = vpop.permute.xlu2 %358 }
  0xa7   : > { %422 = vst.msk [vmem:[#allocation2 + $0x68] sm:$0xff] %vm408_vm1, %v339_v48  ;;  %v2860_v48 = vld [vmem:[%s2452_s16 + $0x138] sm:$0xff] }
  0xa8   : > { %432 = vst.msk [vmem:[#allocation2 + $0xb8] sm:$0xff] %vm408_vm1, %v359_v47  ;;  %v2867_v47 = vld [vmem:[%s2452_s16 + $0x140] sm:$0xff] }
  0xa9   : > { %242 = vst.msk [vmem:[#allocation2 + $0xd0] sm:$0xff] %vm215_vm0, %v2860_v48 }
  0xaa   : > { %243 = vst.msk [vmem:[#allocation2 + $0xd8] sm:$0xff] %vm215_vm0, %v2867_v47 }
  0xab   : > { %555 = vrot.lane.b32.xlu0 %v466_v60, %s2405_s18  ;;  %557 = vrot.lane.b32.xlu1 %v467_v56, %s2405_s18  ;;  %v469_v60 = vld [vmem:[%s2452_s16 + $0x152] sm:$0xff]  ;;  %v2875_v56 = vld [vmem:[%s2452_s16 + $0x15a] sm:$0xff] }
  0xac   : > { %559 = vrot.lane.b32.xlu2 %v2852_v43, %s2405_s18  ;;  %3670 = vst [vmem:[#allocation22_spill] sm:$0xff] %v2875_v56 }
  0xad   : > { %v343_v55 = vpop.permute.xlu0 %342  ;;  %v345_v41 = vpop.permute.xlu1 %344 }
  0xae   : > { %424 = vst.msk [vmem:[#allocation2 + $0x78] sm:$0xff] %vm408_vm1, %v343_v55  ;;  %v365_v40 = vpop.permute.xlu2 %364  ;;  %v2887_v55 = vld [vmem:[%s2452_s16 + $0x150] sm:$0xff] }
  0xaf   : > { %425 = vst.msk [vmem:[#allocation2 + $0x80] sm:$0xff] %vm408_vm1, %v345_v41  ;;  %v2890_v41 = vld [vmem:[%s2452_s16 + $0x158] sm:$0xff] }
  0xb0   : > { %435 = vst.msk [vmem:[#allocation2 + $0xd0] sm:$0xff] %vm408_vm1, %v365_v40  ;;  %v2897_v40 = vld [vmem:[%s2452_s16 + $0x168] sm:$0xff] }
  0xb1   : > { %244 = vst.msk [vmem:[#allocation2 + $0xe0] sm:$0xff] %vm215_vm0, %v2887_v55 }
  0xb2   : > { %245 = vst.msk [vmem:[#allocation2 + $0xe8] sm:$0xff] %vm215_vm0, %v2890_v41 }
  0xb3   : > { %561 = vrot.lane.b32.xlu0 %v469_v60, %s2405_s18  ;;  %563 = vrot.lane.b32.xlu1 %v2875_v56, %s2405_s18  ;;  %v2904_v60 = vld [vmem:[%s2452_s16 + $0x172] sm:$0xff]  ;;  %246 = vst.msk [vmem:[#allocation2 + $0xf0] sm:$0xff] %vm215_vm0, %v2897_v40 }
  0xb4   : > { %565 = vrot.lane.b32.xlu2 %v2881_v36, %s2405_s18  ;;  %3672 = vst [vmem:[#allocation24_spill] sm:$0xff] %v2904_v60 }
  0xb5   : > { %v349_v43 = vpop.permute.xlu0 %348  ;;  %v351_v35 = vpop.permute.xlu1 %350 }
  0xb6   : > { %427 = vst.msk [vmem:[#allocation2 + $0x90] sm:$0xff] %vm408_vm1, %v349_v43  ;;  %v371_v56 = vpop.permute.xlu2 %370  ;;  %v2914_v43 = vld [vmem:[%s2452_s16 + $0x170] sm:$0xff] }
  0xb7   : > { %428 = vst.msk [vmem:[#allocation2 + $0x98] sm:$0xff] %vm408_vm1, %v351_v35 }
  0xb8   : > { %438 = vst.msk [vmem:[#allocation2 + $0xe8] sm:$0xff] %vm408_vm1, %v371_v56 }
  0xb9   : > { %247 = vst.msk [vmem:[#allocation2 + $0xf8] sm:$0xff] %vm215_vm0, %v2914_v43 }
  0xbb   : > { %567 = vrot.lane.b32.xlu0 %v2904_v60, %s2405_s18  ;;  %699 = vrot.lane.b32.xlu1 %v2623_v37, %s2406_s19 }
  0xbc   : > { %701 = vrot.lane.b32.xlu2 %v2651_v44, %s2406_s19 }
  0xbd   : > { %v355_v35 = vpop.permute.xlu0 %354  ;;  %v357_v36 = vpop.permute.xlu1 %356 }
  0xbe   : > { %430 = vst.msk [vmem:[#allocation2 + $0xa8] sm:$0xff] %vm408_vm1, %v355_v35  ;;  %v506_v56 = vpop.permute.xlu2 %505 }
  0xbf   : > { %431 = vst.msk [vmem:[#allocation2 + $0xb0] sm:$0xff] %vm408_vm1, %v357_v36 }
  0xc0   : > { %602 = vst.msk [vmem:[#allocation2] sm:$0xff] %vm601_vm2, %v506_v56 }
  0xc3   : > { %703 = vrot.lane.b32.xlu0 %v2626_v38, %s2406_s19  ;;  %705 = vrot.lane.b32.xlu1 %v2654_v45, %s2406_s19 }
  0xc4   : > { %707 = vrot.lane.b32.xlu2 %v2659_v46, %s2406_s19 }
  0xc5   : > { %v361_v37 = vpop.permute.xlu0 %360  ;;  %v363_v60 = vpop.permute.xlu1 %362 }
  0xc6   : > { %433 = vst.msk [vmem:[#allocation2 + $0xc0] sm:$0xff] %vm408_vm1, %v361_v37  ;;  %v512_v44 = vpop.permute.xlu2 %511 }
  0xc7   : > { %434 = vst.msk [vmem:[#allocation2 + $0xc8] sm:$0xff] %vm408_vm1, %v363_v60 }
  0xc8   : > { %605 = vst.msk [vmem:[#allocation2 + $0x18] sm:$0xff] %vm601_vm2, %v512_v44 }
  0xcb   : > { %709 = vrot.lane.b32.xlu0 %v2682_v51, %s2406_s19  ;;  %711 = vrot.lane.b32.xlu1 %v2685_v52, %s2406_s19 }
  0xcc   : > { %713 = vrot.lane.b32.xlu2 %v2690_v53, %s2406_s19 }
  0xcd   : > { %v367_v36 = vpop.permute.xlu0 %366  ;;  %v369_v38 = vpop.permute.xlu1 %368 }
  0xce   : > { %436 = vst.msk [vmem:[#allocation2 + $0xd8] sm:$0xff] %vm408_vm1, %v367_v36  ;;  %v518_v45 = vpop.permute.xlu2 %517 }
  0xcf   : > { %437 = vst.msk [vmem:[#allocation2 + $0xe0] sm:$0xff] %vm408_vm1, %v369_v38 }
  0xd0   : > { %608 = vst.msk [vmem:[#allocation2 + $0x30] sm:$0xff] %vm601_vm2, %v518_v45 }
  0xd3   : > { %715 = vrot.lane.b32.xlu0 %v2713_v58, %s2406_s19  ;;  %717 = vrot.lane.b32.xlu1 %v2716_v59, %s2406_s19 }
  0xd4   : > { %719 = vrot.lane.b32.xlu2 %v2723_v62, %s2406_s19 }
  0xd5   : > { %v373_v46 = vpop.permute.xlu0 %372  ;;  %v375_v51 = vpop.permute.xlu1 %374 }
  0xd6   : > { %439 = vst.msk [vmem:[#allocation2 + $0xf0] sm:$0xff] %vm408_vm1, %v373_v46  ;;  %v524_v52 = vpop.permute.xlu2 %523 }
  0xd7   : > { %440 = vst.msk [vmem:[#allocation2 + $0xf8] sm:$0xff] %vm408_vm1, %v375_v51 }
  0xd8   : > { %611 = vst.msk [vmem:[#allocation2 + $0x48] sm:$0xff] %vm601_vm2, %v524_v52  ;;  %v3112_v52 = vld [vmem:[%s2452_s16 + $0x189] sm:$0xff] }
  0xdb   : > { %721 = vrot.lane.b32.xlu0 %v2746_v33, %s2406_s19  ;;  %723 = vrot.lane.b32.xlu1 %v2749_v34, %s2406_s19 }
  0xdc   : > { %725 = vrot.lane.b32.xlu2 %v2756_v49, %s2406_s19 }
  0xdd   : > { %v508_v53 = vpop.permute.xlu0 %507  ;;  %v510_v58 = vpop.permute.xlu1 %509 }
  0xde   : > { %603 = vst.msk [vmem:[#allocation2 + $0x8] sm:$0xff] %vm601_vm2, %v508_v53  ;;  %v530_v59 = vpop.permute.xlu2 %529 }
  0xdf   : > { %604 = vst.msk [vmem:[#allocation2 + $0x10] sm:$0xff] %vm601_vm2, %v510_v58 }
  0xe0   : > { %614 = vst.msk [vmem:[#allocation2 + $0x60] sm:$0xff] %vm601_vm2, %v530_v59  ;;  %v3674_v59 = vld [vmem:[#allocation4_spill] sm:$0xff] }
  0xe3   : > { %727 = vrot.lane.b32.xlu0 %v2779_v39, %s2406_s19  ;;  %729 = vrot.lane.b32.xlu1 %v2782_v42, %s2406_s19 }
  0xe4   : > { %731 = vrot.lane.b32.xlu2 %v2789_v0, %s2406_s19 }
  0xe5   : > { %v514_v62 = vpop.permute.xlu0 %513  ;;  %v516_v33 = vpop.permute.xlu1 %515 }
  0xe6   : > { %606 = vst.msk [vmem:[#allocation2 + $0x20] sm:$0xff] %vm601_vm2, %v514_v62  ;;  %v536_v34 = vpop.permute.xlu2 %535  ;;  %v3675_v62 = vld [vmem:[#allocation5_spill] sm:$0xff] }
  0xe7   : > { %607 = vst.msk [vmem:[#allocation2 + $0x28] sm:$0xff] %vm601_vm2, %v516_v33 }
  0xe8   : > { %617 = vst.msk [vmem:[#allocation2 + $0x78] sm:$0xff] %vm601_vm2, %v536_v34 }
  0xeb   : > { %733 = vrot.lane.b32.xlu0 %v2807_v32, %s2406_s19  ;;  %735 = vrot.lane.b32.xlu1 %v2810_v61, %s2406_s19 }
  0xec   : > { %737 = vrot.lane.b32.xlu2 %v2817_v63, %s2406_s19 }
  0xed   : > { %v520_v49 = vpop.permute.xlu0 %519  ;;  %v522_v60 = vpop.permute.xlu1 %521 }
  0xee   : > { %609 = vst.msk [vmem:[#allocation2 + $0x38] sm:$0xff] %vm601_vm2, %v520_v49  ;;  %v542_v35 = vpop.permute.xlu2 %541  ;;  %v3676_v49 = vld [vmem:[#allocation6_spill] sm:$0xff] }
  0xef   : > { %610 = vst.msk [vmem:[#allocation2 + $0x40] sm:$0xff] %vm601_vm2, %v522_v60 }
  0xf0   : > { %620 = vst.msk [vmem:[#allocation2 + $0x90] sm:$0xff] %vm601_vm2, %v542_v35  ;;  %v3677_v35 = vld [vmem:[#allocation7_spill] sm:$0xff] }
  0xf3   : > { %739 = vrot.lane.b32.xlu0 %v2831_v57, %s2406_s19  ;;  %741 = vrot.lane.b32.xlu1 %v2834_v3, %s2406_s19 }
  0xf4   : > { %743 = vrot.lane.b32.xlu2 %v2841_v54, %s2406_s19 }
  0xf5   : > { %v526_v56 = vpop.permute.xlu0 %525  ;;  %v528_v61 = vpop.permute.xlu1 %527 }
  0xf6   : > { %612 = vst.msk [vmem:[#allocation2 + $0x50] sm:$0xff] %vm601_vm2, %v526_v56  ;;  %v548_v63 = vpop.permute.xlu2 %547  ;;  %v3678_v56 = vld [vmem:[#allocation8_spill] sm:$0xff] }
  0xf7   : > { %613 = vst.msk [vmem:[#allocation2 + $0x58] sm:$0xff] %vm601_vm2, %v528_v61 }
  0xf8   : > { %623 = vst.msk [vmem:[#allocation2 + $0xa8] sm:$0xff] %vm601_vm2, %v548_v63 }
  0xfb   : > { %745 = vrot.lane.b32.xlu0 %v2857_v50, %s2406_s19  ;;  %747 = vrot.lane.b32.xlu1 %v2860_v48, %s2406_s19 }
  0xfc   : > { %749 = vrot.lane.b32.xlu2 %v2867_v47, %s2406_s19  ;;  %v3004_v47 = vld [vmem:[%s2452_s16 + $0x180] sm:$0xff] }
  0xfd   : > { %v532_v57 = vpop.permute.xlu0 %531  ;;  %v534_v3 = vpop.permute.xlu1 %533 }
  0xfe   : > { %615 = vst.msk [vmem:[#allocation2 + $0x68] sm:$0xff] %vm601_vm2, %v532_v57  ;;  %v554_v54 = vpop.permute.xlu2 %553  ;;  %v3679_v57 = vld [vmem:[#allocation9_spill] sm:$0xff] }
  0xff   : > { %616 = vst.msk [vmem:[#allocation2 + $0x70] sm:$0xff] %vm601_vm2, %v534_v3 }
 0x100   : > { %626 = vst.msk [vmem:[#allocation2 + $0xc0] sm:$0xff] %vm601_vm2, %v554_v54  ;;  %v3680_v54 = vld [vmem:[#allocation10_spill] sm:$0xff] }
 0x103   : > { %751 = vrot.lane.b32.xlu0 %v2887_v55, %s2406_s19  ;;  %753 = vrot.lane.b32.xlu1 %v2890_v41, %s2406_s19  ;;  %v3012_v41 = vld [vmem:[%s2452_s16 + $0x188] sm:$0xff] }
 0x104   : > { %755 = vrot.lane.b32.xlu2 %v2897_v40, %s2406_s19 }
 0x105   : > { %v538_v50 = vpop.permute.xlu0 %537  ;;  %v540_v48 = vpop.permute.xlu1 %539 }
 0x106   : > { %618 = vst.msk [vmem:[#allocation2 + $0x80] sm:$0xff] %vm601_vm2, %v538_v50  ;;  %v560_v37 = vpop.permute.xlu2 %559  ;;  %v3681_v50 = vld [vmem:[#allocation11_spill] sm:$0xff] }
 0x107   : > { %619 = vst.msk [vmem:[#allocation2 + $0x88] sm:$0xff] %vm601_vm2, %v540_v48 }
 0x108   : > { %629 = vst.msk [vmem:[#allocation2 + $0xd8] sm:$0xff] %vm601_vm2, %v560_v37 }
 0x10b   : > { %757 = vrot.lane.b32.xlu0 %v2914_v43, %s2406_s19  ;;  %759 = vrot.lane.b32.xlu1 %v3004_v47, %s2406_s19 }
 0x10c   : > { %761 = vrot.lane.b32.xlu2 %v3012_v41, %s2406_s19 }
 0x10d   : > { %v544_v44 = vpop.permute.xlu0 %543  ;;  %v546_v36 = vpop.permute.xlu1 %545 }
 0x10e   : > { %621 = vst.msk [vmem:[#allocation2 + $0x98] sm:$0xff] %vm601_vm2, %v544_v44  ;;  %v566_v38 = vpop.permute.xlu2 %565  ;;  %v3682_v44 = vld [vmem:[#allocation12_spill] sm:$0xff] }
 0x10f   : > { %622 = vst.msk [vmem:[#allocation2 + $0xa0] sm:$0xff] %vm601_vm2, %v546_v36 }
 0x110   : > { %632 = vst.msk [vmem:[#allocation2 + $0xf0] sm:$0xff] %vm601_vm2, %v566_v38  ;;  %v3683_v38 = vld [vmem:[#allocation13_spill] sm:$0xff] }
 0x113   : > { %892 = vrot.lane.b32.xlu0 %v2456_v1, %s2407_s20  ;;  %894 = vrot.lane.b32.xlu1 %v2468_v4, %s2407_s20 }
 0x114   : > { %896 = vrot.lane.b32.xlu2 %v2462_v2, %s2407_s20 }
 0x115   : > { %v550_v45 = vpop.permute.xlu0 %549  ;;  %v552_v46 = vpop.permute.xlu1 %551 }
 0x116   : > { %624 = vst.msk [vmem:[#allocation2 + $0xb0] sm:$0xff] %vm601_vm2, %v550_v45  ;;  %v702_v51 = vpop.permute.xlu2 %701  ;;  %v3684_v45 = vld [vmem:[#allocation14_spill] sm:$0xff] }
 0x117   : > { %625 = vst.msk [vmem:[#allocation2 + $0xb8] sm:$0xff] %vm601_vm2, %v552_v46 }
 0x118   : > { %797 = vst.msk [vmem:[#allocation2 + $0x8] sm:$0xff] %vm795_vm3, %v702_v51 }
 0x11b   : > { %898 = vrot.lane.b32.xlu0 %v2474_v5, %s2407_s20  ;;  %900 = vrot.lane.b32.xlu1 %v2479_v6, %s2407_s20 }
 0x11c   : > { %902 = vrot.lane.b32.xlu2 %v2482_v7, %s2407_s20 }
 0x11d   : > { %v556_v1 = vpop.permute.xlu0 %555  ;;  %v558_v4 = vpop.permute.xlu1 %557 }
 0x11e   : > { %627 = vst.msk [vmem:[#allocation2 + $0xc8] sm:$0xff] %vm601_vm2, %v556_v1  ;;  %v708_v2 = vpop.permute.xlu2 %707  ;;  %v3685_v1 = vld [vmem:[#allocation15_spill] sm:$0xff] }
 0x11f   : > { %628 = vst.msk [vmem:[#allocation2 + $0xd0] sm:$0xff] %vm601_vm2, %v558_v4 }
 0x120   : > { %800 = vst.msk [vmem:[#allocation2 + $0x20] sm:$0xff] %vm795_vm3, %v708_v2  ;;  %v3686_v2 = vld [vmem:[#allocation16_spill] sm:$0xff] }
 0x123   : > { %904 = vrot.lane.b32.xlu0 %v2489_v8, %s2407_s20  ;;  %906 = vrot.lane.b32.xlu1 %v2494_v9, %s2407_s20 }
 0x124   : > { %908 = vrot.lane.b32.xlu2 %v2497_v10, %s2407_s20 }
 0x125   : > { %v562_v5 = vpop.permute.xlu0 %561  ;;  %v564_v6 = vpop.permute.xlu1 %563 }
 0x126   : > { %630 = vst.msk [vmem:[#allocation2 + $0xe0] sm:$0xff] %vm601_vm2, %v562_v5  ;;  %v714_v7 = vpop.permute.xlu2 %713  ;;  %v3687_v5 = vld [vmem:[#allocation17_spill] sm:$0xff] }
 0x127   : > { %631 = vst.msk [vmem:[#allocation2 + $0xe8] sm:$0xff] %vm601_vm2, %v564_v6 }
 0x128   : > { %803 = vst.msk [vmem:[#allocation2 + $0x38] sm:$0xff] %vm795_vm3, %v714_v7 }
 0x12b   : > { %910 = vrot.lane.b32.xlu0 %v2504_v11, %s2407_s20  ;;  %912 = vrot.lane.b32.xlu1 %v2509_v12, %s2407_s20 }
 0x12c   : > { %914 = vrot.lane.b32.xlu2 %v2512_v13, %s2407_s20 }
 0x12d   : > { %v568_v8 = vpop.permute.xlu0 %567  ;;  %v700_v9 = vpop.permute.xlu1 %699 }
 0x12e   : > { %633 = vst.msk [vmem:[#allocation2 + $0xf8] sm:$0xff] %vm601_vm2, %v568_v8  ;;  %v720_v10 = vpop.permute.xlu2 %719  ;;  %v3688_v8 = vld [vmem:[#allocation18_spill] sm:$0xff] }
 0x12f   : > { %796 = vst.msk [vmem:[#allocation2] sm:$0xff] %vm795_vm3, %v700_v9  ;;  %v3169_v9 = vld [vmem:[%s2452_s16 + $0x18a] sm:$0xff] }
 0x130   : > { %806 = vst.msk [vmem:[#allocation2 + $0x50] sm:$0xff] %vm795_vm3, %v720_v10 }
 0x133   : > { %916 = vrot.lane.b32.xlu0 %v2519_v14, %s2407_s20  ;;  %918 = vrot.lane.b32.xlu1 %v2524_v15, %s2407_s20 }
 0x134   : > { %920 = vrot.lane.b32.xlu2 %v2527_v16, %s2407_s20 }
 0x135   : > { %v704_v11 = vpop.permute.xlu0 %703  ;;  %v706_v12 = vpop.permute.xlu1 %705 }
 0x136   : > { %798 = vst.msk [vmem:[#allocation2 + $0x10] sm:$0xff] %vm795_vm3, %v704_v11  ;;  %v726_v13 = vpop.permute.xlu2 %725  ;;  %v2240_v11 = vld [vmem:[%s2452_s16 + $0x1a0] sm:$0xff] }
 0x137   : > { %799 = vst.msk [vmem:[#allocation2 + $0x18] sm:$0xff] %vm795_vm3, %v706_v12 }
 0x138   : > { %809 = vst.msk [vmem:[#allocation2 + $0x68] sm:$0xff] %vm795_vm3, %v726_v13 }
 0x13b   : > { %922 = vrot.lane.b32.xlu0 %v2534_v17, %s2407_s20  ;;  %924 = vrot.lane.b32.xlu1 %v2539_v18, %s2407_s20 }
 0x13c   : > { %926 = vrot.lane.b32.xlu2 %v2542_v19, %s2407_s20 }
 0x13d   : > { %v710_v14 = vpop.permute.xlu0 %709  ;;  %v712_v15 = vpop.permute.xlu1 %711 }
 0x13e   : > { %801 = vst.msk [vmem:[#allocation2 + $0x28] sm:$0xff] %vm795_vm3, %v710_v14  ;;  %v732_v16 = vpop.permute.xlu2 %731  ;;  %v2256_v14 = vld [vmem:[%s2452_s16 + $0xe1] sm:$0xff] }
 0x13f   : > { %802 = vst.msk [vmem:[#allocation2 + $0x30] sm:$0xff] %vm795_vm3, %v712_v15  ;;  %v2272_v15 = vld [vmem:[%s2452_s16 + $0x1a1] sm:$0xff] }
 0x140   : > { %812 = vst.msk [vmem:[#allocation2 + $0x80] sm:$0xff] %vm795_vm3, %v732_v16 }
 0x143   : > { %928 = vrot.lane.b32.xlu0 %v2549_v20, %s2407_s20  ;;  %930 = vrot.lane.b32.xlu1 %v2554_v21, %s2407_s20 }
 0x144   : > { %932 = vrot.lane.b32.xlu2 %v2557_v22, %s2407_s20 }
 0x145   : > { %v716_v17 = vpop.permute.xlu0 %715  ;;  %v718_v18 = vpop.permute.xlu1 %717 }
 0x146   : > { %804 = vst.msk [vmem:[#allocation2 + $0x40] sm:$0xff] %vm795_vm3, %v716_v17  ;;  %v738_v19 = vpop.permute.xlu2 %737 }
 0x147   : > { %805 = vst.msk [vmem:[#allocation2 + $0x48] sm:$0xff] %vm795_vm3, %v718_v18  ;;  %v3689_v18 = vld [vmem:[#allocation20_spill] sm:$0xff] }
 0x148   : > { %815 = vst.msk [vmem:[#allocation2 + $0x98] sm:$0xff] %vm795_vm3, %v738_v19  ;;  %v2304_v19 = vld [vmem:[%s2452_s16 + $0x1a2] sm:$0xff] }
 0x14b   : > { %934 = vrot.lane.b32.xlu0 %v2564_v23, %s2407_s20  ;;  %936 = vrot.lane.b32.xlu1 %v2569_v24, %s2407_s20 }
 0x14c   : > { %938 = vrot.lane.b32.xlu2 %v2572_v25, %s2407_s20 }
 0x14d   : > { %v722_v20 = vpop.permute.xlu0 %721  ;;  %v724_v21 = vpop.permute.xlu1 %723 }
 0x14e   : > { %807 = vst.msk [vmem:[#allocation2 + $0x58] sm:$0xff] %vm795_vm3, %v722_v20  ;;  %v744_v22 = vpop.permute.xlu2 %743  ;;  %v3191_v20 = vld [vmem:[%s2452_s16 + $0x182] sm:$0xff] }
 0x14f   : > { %808 = vst.msk [vmem:[#allocation2 + $0x60] sm:$0xff] %vm795_vm3, %v724_v21 }
 0x150   : > { %818 = vst.msk [vmem:[#allocation2 + $0xb0] sm:$0xff] %vm795_vm3, %v744_v22 }
 0x153   : > { %940 = vrot.lane.b32.xlu0 %v2579_v26, %s2407_s20  ;;  %942 = vrot.lane.b32.xlu1 %v2584_v27, %s2407_s20 }
 0x154   : > { %944 = vrot.lane.b32.xlu2 %v2587_v28, %s2407_s20  ;;  %v3109_v28 = vld [vmem:[%s2452_s16 + $0x181] sm:$0xff] }
 0x155   : > { %v728_v23 = vpop.permute.xlu0 %727  ;;  %v730_v24 = vpop.permute.xlu1 %729 }
 0x156   : > { %810 = vst.msk [vmem:[#allocation2 + $0x70] sm:$0xff] %vm795_vm3, %v728_v23  ;;  %v750_v25 = vpop.permute.xlu2 %749 }
 0x157   : > { %811 = vst.msk [vmem:[#allocation2 + $0x78] sm:$0xff] %vm795_vm3, %v730_v24  ;;  %v2239_v24 = vld [vmem:[%s2452_s16 + $0x198] sm:$0xff] }
 0x158   : > { %821 = vst.msk [vmem:[#allocation2 + $0xc8] sm:$0xff] %vm795_vm3, %v750_v25  ;;  %v2255_v25 = vld [vmem:[%s2452_s16 + $0xd9] sm:$0xff] }
 0x15b   : > { %946 = vrot.lane.b32.xlu0 %v2594_v29, %s2407_s20  ;;  %948 = vrot.lane.b32.xlu1 %v2599_v30, %s2407_s20 }
 0x15c   : > { %950 = vrot.lane.b32.xlu2 %v2602_v31, %s2407_s20  ;;  %v3673_v31 = vld [vmem:[#allocation3_spill] sm:$0xff] }
 0x15d   : > { %v734_v26 = vpop.permute.xlu0 %733  ;;  %v736_v27 = vpop.permute.xlu1 %735 }
 0x15e   : > { %813 = vst.msk [vmem:[#allocation2 + $0x88] sm:$0xff] %vm795_vm3, %v734_v26  ;;  %v756_v53 = vpop.permute.xlu2 %755 }
 0x15f   : > { %814 = vst.msk [vmem:[#allocation2 + $0x90] sm:$0xff] %vm795_vm3, %v736_v27  ;;  %v2271_v27 = vld [vmem:[%s2452_s16 + $0x199] sm:$0xff] }
 0x160   : > { %824 = vst.msk [vmem:[#allocation2 + $0xe0] sm:$0xff] %vm795_vm3, %v756_v53 }
 0x163   : > { %952 = vrot.lane.b32.xlu0 %v3109_v28, %s2407_s20  ;;  %954 = vrot.lane.b32.xlu1 %v3112_v52, %s2407_s20 }
 0x164   : > { %1085 = vrot.lane.b32.xlu2 %v3673_v31, %s2408_s21  ;;  %v3690_v31 = vld [vmem:[#allocation19_spill] sm:$0xff] }
 0x165   : > { %v740_v29 = vpop.permute.xlu0 %739  ;;  %v742_v30 = vpop.permute.xlu1 %741 }
 0x166   : > { %816 = vst.msk [vmem:[#allocation2 + $0xa0] sm:$0xff] %vm795_vm3, %v740_v29  ;;  %v762_v58 = vpop.permute.xlu2 %761 }
 0x167   : > { %817 = vst.msk [vmem:[#allocation2 + $0xa8] sm:$0xff] %vm795_vm3, %v742_v30 }
 0x168   : > { %827 = vst.msk [vmem:[#allocation2 + $0xf8] sm:$0xff] %vm795_vm3, %v762_v58 }
 0x16b   : > { %1087 = vrot.lane.b32.xlu0 %v3674_v59, %s2408_s21  ;;  %1089 = vrot.lane.b32.xlu1 %v3675_v62, %s2408_s21  ;;  %v3691_v62 = vld [vmem:[#allocation24_spill] sm:$0xff] }
 0x16c   : > { %1091 = vrot.lane.b32.xlu2 %v3676_v49, %s2408_s21 }
 0x16d   : > { %v746_v33 = vpop.permute.xlu0 %745  ;;  %v748_v34 = vpop.permute.xlu1 %747 }
 0x16e   : > { %819 = vst.msk [vmem:[#allocation2 + $0xb8] sm:$0xff] %vm795_vm3, %v746_v33  ;;  %v897_v60 = vpop.permute.xlu2 %896 }
 0x16f   : > { %820 = vst.msk [vmem:[#allocation2 + $0xc0] sm:$0xff] %vm795_vm3, %v748_v34  ;;  %v2254_v34 = vld [vmem:[%s2452_s16 + $0xc9] sm:$0xff] }
 0x170   : > { %991 = vst.msk [vmem:[#allocation2 + $0x10] sm:$0xff] %vm988_vm4, %v897_v60 }
 0x173   : > { %1093 = vrot.lane.b32.xlu0 %v3677_v35, %s2408_s21  ;;  %1095 = vrot.lane.b32.xlu1 %v3678_v56, %s2408_s21  ;;  %v2286_v35 = vld [vmem:[%s2452_s16 + $0xca] sm:$0xff] }
 0x174   : > { %1097 = vrot.lane.b32.xlu2 %v3679_v57, %s2408_s21 }
 0x175   : > { %v752_v61 = vpop.permute.xlu0 %751  ;;  %v754_v63 = vpop.permute.xlu1 %753 }
 0x176   : > { %822 = vst.msk [vmem:[#allocation2 + $0xd0] sm:$0xff] %vm795_vm3, %v752_v61  ;;  %v903_v3 = vpop.permute.xlu2 %902 }
 0x177   : > { %823 = vst.msk [vmem:[#allocation2 + $0xd8] sm:$0xff] %vm795_vm3, %v754_v63  ;;  %v3692_v63 = vld [vmem:[#allocation23_spill] sm:$0xff] }
 0x178   : > { %994 = vst.msk [vmem:[#allocation2 + $0x28] sm:$0xff] %vm988_vm4, %v903_v3  ;;  %v2253_v3 = vld [vmem:[%s2452_s16 + $0xc1] sm:$0xff] }
 0x17b   : > { %1099 = vrot.lane.b32.xlu0 %v3680_v54, %s2408_s21  ;;  %1101 = vrot.lane.b32.xlu1 %v3681_v50, %s2408_s21 }
 0x17c   : > { %1103 = vrot.lane.b32.xlu2 %v3682_v44, %s2408_s21 }
 0x17d   : > { %v758_v48 = vpop.permute.xlu0 %757  ;;  %v760_v37 = vpop.permute.xlu1 %759 }
 0x17e   : > { %825 = vst.msk [vmem:[#allocation2 + $0xe8] sm:$0xff] %vm795_vm3, %v758_v48  ;;  %v909_v36 = vpop.permute.xlu2 %908 }
 0x17f   : > { %826 = vst.msk [vmem:[#allocation2 + $0xf0] sm:$0xff] %vm795_vm3, %v760_v37  ;;  %v3693_v37 = vld [vmem:[#allocation22_spill] sm:$0xff] }
 0x180   : > { %997 = vst.msk [vmem:[#allocation2 + $0x40] sm:$0xff] %vm988_vm4, %v909_v36 }
 0x183   : > { %1105 = vrot.lane.b32.xlu0 %v3683_v38, %s2408_s21  ;;  %1107 = vrot.lane.b32.xlu1 %v3684_v45, %s2408_s21  ;;  %v2252_v38 = vld [vmem:[%s2452_s16 + $0xb1] sm:$0xff] }
 0x184   : > { %1109 = vrot.lane.b32.xlu2 %v3685_v1, %s2408_s21 }
 0x185   : > { %v893_v46 = vpop.permute.xlu0 %892  ;;  %v895_v51 = vpop.permute.xlu1 %894 }
 0x186   : > { %989 = vst.msk [vmem:[#allocation2] sm:$0xff] %vm988_vm4, %v893_v46  ;;  %v915_v4 = vpop.permute.xlu2 %914  ;;  %v2268_v46 = vld [vmem:[%s2452_s16 + $0x171] sm:$0xff] }
 0x187   : > { %990 = vst.msk [vmem:[#allocation2 + $0x8] sm:$0xff] %vm988_vm4, %v895_v51 }
 0x188   : > { %1000 = vst.msk [vmem:[#allocation2 + $0x58] sm:$0xff] %vm988_vm4, %v915_v4  ;;  %v2284_v4 = vld [vmem:[%s2452_s16 + $0xb2] sm:$0xff] }
 0x18b   : > { %1111 = vrot.lane.b32.xlu0 %v3686_v2, %s2408_s21  ;;  %1113 = vrot.lane.b32.xlu1 %v3687_v5, %s2408_s21 }
 0x18c   : > { %1115 = vrot.lane.b32.xlu2 %v3688_v8, %s2408_s21 }
 0x18d   : > { %v899_v6 = vpop.permute.xlu0 %898  ;;  %v901_v7 = vpop.permute.xlu1 %900 }
 0x18e   : > { %992 = vst.msk [vmem:[#allocation2 + $0x18] sm:$0xff] %vm988_vm4, %v899_v6  ;;  %v921_v10 = vpop.permute.xlu2 %920 }
 0x18f   : > { %993 = vst.msk [vmem:[#allocation2 + $0x20] sm:$0xff] %vm988_vm4, %v901_v7  ;;  %v2219_v7 = vld [vmem:[%s2452_s16 + $0xa8] sm:$0xff] }
 0x190   : > { %1003 = vst.msk [vmem:[#allocation2 + $0x70] sm:$0xff] %vm988_vm4, %v921_v10 }
 0x193   : > { %1147 = vrot.lane.b32.xlu0 %v3169_v9, %s2408_s21  ;;  %1309 = vrot.lane.b32.xlu1 %v2807_v32, %s2409_s22 }
 0x194   : > { %1341 = vrot.lane.b32.xlu2 %v2240_v11, %s2409_s22 }
 0x195   : > { %v905_v12 = vpop.permute.xlu0 %904  ;;  %v907_v13 = vpop.permute.xlu1 %906 }
 0x196   : > { %995 = vst.msk [vmem:[#allocation2 + $0x30] sm:$0xff] %vm988_vm4, %v905_v12  ;;  %v927_v16 = vpop.permute.xlu2 %926  ;;  %v2267_v12 = vld [vmem:[%s2452_s16 + $0x169] sm:$0xff] }
 0x197   : > { %996 = vst.msk [vmem:[#allocation2 + $0x38] sm:$0xff] %vm988_vm4, %v907_v13  ;;  %v2283_v13 = vld [vmem:[%s2452_s16 + $0xaa] sm:$0xff] }
 0x198   : > { %1006 = vst.msk [vmem:[#allocation2 + $0x88] sm:$0xff] %vm988_vm4, %v927_v16  ;;  %v2218_v16 = vld [vmem:[%s2452_s16 + $0x98] sm:$0xff] }
 0x19b   : > { %1502 = vrot.lane.b32.xlu0 %v2256_v14, %s2410_s23  ;;  %1534 = vrot.lane.b32.xlu1 %v2272_v15, %s2410_s23 }
 0x19c   : > { %1695 = vrot.lane.b32.xlu2 %v3689_v18, %s2411_s24  ;;  %v2234_v18 = vld [vmem:[%s2452_s16 + $0x158] sm:$0xff] }
 0x19d   : > { %v911_v32 = vpop.permute.xlu0 %910  ;;  %v913_v17 = vpop.permute.xlu1 %912 }
 0x19e   : > { %998 = vst.msk [vmem:[#allocation2 + $0x48] sm:$0xff] %vm988_vm4, %v911_v32  ;;  %v933_v21 = vpop.permute.xlu2 %932 }
 0x19f   : > { %999 = vst.msk [vmem:[#allocation2 + $0x50] sm:$0xff] %vm988_vm4, %v913_v17  ;;  %v3694_v17 = vld [vmem:[#allocation21_spill] sm:$0xff] }
 0x1a0   : > { %1009 = vst.msk [vmem:[#allocation2 + $0xa0] sm:$0xff] %vm988_vm4, %v933_v21  ;;  %v2250_v21 = vld [vmem:[%s2452_s16 + $0x99] sm:$0xff] }
 0x1a3   : > { %1727 = vrot.lane.b32.xlu0 %v2304_v19, %s2411_s24  ;;  %1145 = vrot.lane.b32.xlu1 %v3191_v20, %s2408_s21 }
 0x1a4   : > { %1307 = vrot.lane.b32.xlu2 %v2789_v0, %s2409_s22  ;;  %v2303_v0 = vld [vmem:[%s2452_s16 + $0x19a] sm:$0xff] }
 0x1a5   : > { %v917_v22 = vpop.permute.xlu0 %916  ;;  %v919_v23 = vpop.permute.xlu1 %918 }
 0x1a6   : > { %1001 = vst.msk [vmem:[#allocation2 + $0x60] sm:$0xff] %vm988_vm4, %v917_v22  ;;  %v939_v26 = vpop.permute.xlu2 %938  ;;  %v2266_v22 = vld [vmem:[%s2452_s16 + $0x159] sm:$0xff] }
 0x1a7   : > { %1002 = vst.msk [vmem:[#allocation2 + $0x68] sm:$0xff] %vm988_vm4, %v919_v23 }
 0x1a8   : > { %1012 = vst.msk [vmem:[#allocation2 + $0xb8] sm:$0xff] %vm988_vm4, %v939_v26 }
 0x1ab   : > { %1339 = vrot.lane.b32.xlu0 %v2239_v24, %s2409_s22  ;;  %1500 = vrot.lane.b32.xlu1 %v2255_v25, %s2410_s23  ;;  %v2282_v24 = vld [vmem:[%s2452_s16 + $0x9a] sm:$0xff] }
 0x1ac   : > { %1532 = vrot.lane.b32.xlu2 %v2271_v27, %s2410_s23  ;;  %v2298_v27 = vld [vmem:[%s2452_s16 + $0x15a] sm:$0xff] }
 0x1ad   : > { %v923_v53 = vpop.permute.xlu0 %922  ;;  %v925_v29 = vpop.permute.xlu1 %924 }
 0x1ae   : > { %1004 = vst.msk [vmem:[#allocation2 + $0x78] sm:$0xff] %vm988_vm4, %v923_v53  ;;  %v945_v30 = vpop.permute.xlu2 %944  ;;  %v3322_v53 = vld [vmem:[%s2452_s16 + $0x13a] sm:$0xff] }
 0x1af   : > { %1005 = vst.msk [vmem:[#allocation2 + $0x80] sm:$0xff] %vm988_vm4, %v925_v29 }
 0x1b0   : > { %1015 = vst.msk [vmem:[#allocation2 + $0xd0] sm:$0xff] %vm988_vm4, %v945_v30 }
 0x1b3   : > { %1693 = vrot.lane.b32.xlu0 %v3690_v31, %s2411_s24  ;;  %1725 = vrot.lane.b32.xlu1 %v2303_v0, %s2411_s24  ;;  %v2217_v0 = vld [vmem:[%s2452_s16 + $0x90] sm:$0xff] }
 0x1b4   : > { %1143 = vrot.lane.b32.xlu2 %v3691_v62, %s2408_s21 }
 0x1b5   : > { %v929_v58 = vpop.permute.xlu0 %928  ;;  %v931_v59 = vpop.permute.xlu1 %930 }
 0x1b6   : > { %1007 = vst.msk [vmem:[#allocation2 + $0x90] sm:$0xff] %vm988_vm4, %v929_v58  ;;  %v951_v33 = vpop.permute.xlu2 %950 }
 0x1b7   : > { %1008 = vst.msk [vmem:[#allocation2 + $0x98] sm:$0xff] %vm988_vm4, %v931_v59  ;;  %v2249_v59 = vld [vmem:[%s2452_s16 + $0x91] sm:$0xff] }
 0x1b8   : > { %1018 = vst.msk [vmem:[#allocation2 + $0xe8] sm:$0xff] %vm988_vm4, %v951_v33  ;;  %v2265_v33 = vld [vmem:[%s2452_s16 + $0x151] sm:$0xff] }
 0x1bb   : > { %1305 = vrot.lane.b32.xlu0 %v2782_v42, %s2409_s22  ;;  %1337 = vrot.lane.b32.xlu1 %v3012_v41, %s2409_s22 }
 0x1bc   : > { %1498 = vrot.lane.b32.xlu2 %v2254_v34, %s2410_s23 }
 0x1bd   : > { %v935_v49 = vpop.permute.xlu0 %934  ;;  %v937_v60 = vpop.permute.xlu1 %936 }
 0x1be   : > { %1010 = vst.msk [vmem:[#allocation2 + $0xa8] sm:$0xff] %vm988_vm4, %v935_v49  ;;  %v1086_v56 = vpop.permute.xlu2 %1085 }
 0x1bf   : > { %1011 = vst.msk [vmem:[#allocation2 + $0xb0] sm:$0xff] %vm988_vm4, %v937_v60 }
 0x1c0   : > { %1182 = vst.msk [vmem:[#allocation2] sm:$0xff] %vm1181_vm5, %v1086_v56  ;;  %v3348_v56 = vld [vmem:[%s2452_s16 + $0x12a] sm:$0xff] }
 0x1c3   : > { %1530 = vrot.lane.b32.xlu0 %v3112_v52, %s2410_s23  ;;  %1691 = vrot.lane.b32.xlu1 %v2286_v35, %s2411_s24  ;;  %v2281_v35 = vld [vmem:[%s2452_s16 + $0x92] sm:$0xff] }
 0x1c4   : > { %1723 = vrot.lane.b32.xlu2 %v3169_v9, %s2411_s24  ;;  %v2251_v9 = vld [vmem:[%s2452_s16 + $0xa9] sm:$0xff] }
 0x1c5   : > { %v941_v42 = vpop.permute.xlu0 %940  ;;  %v943_v41 = vpop.permute.xlu1 %942 }
 0x1c6   : > { %1013 = vst.msk [vmem:[#allocation2 + $0xc0] sm:$0xff] %vm988_vm4, %v941_v42  ;;  %v1092_v61 = vpop.permute.xlu2 %1091 }
 0x1c7   : > { %1014 = vst.msk [vmem:[#allocation2 + $0xc8] sm:$0xff] %vm988_vm4, %v943_v41 }
 0x1c8   : > { %1185 = vst.msk [vmem:[#allocation2 + $0x18] sm:$0xff] %vm1181_vm5, %v1092_v61  ;;  %v2216_v61 = vld [vmem:[%s2452_s16 + $0x80] sm:$0xff] }
 0x1cb   : > { %1141 = vrot.lane.b32.xlu0 %v3692_v63, %s2408_s21  ;;  %1303 = vrot.lane.b32.xlu1 %v2779_v39, %s2409_s22  ;;  %v2285_v39 = vld [vmem:[%s2452_s16 + $0xc2] sm:$0xff] }
 0x1cc   : > { %1335 = vrot.lane.b32.xlu2 %v3004_v47, %s2409_s22 }
 0x1cd   : > { %v947_v52 = vpop.permute.xlu0 %946  ;;  %v949_v57 = vpop.permute.xlu1 %948 }
 0x1ce   : > { %1016 = vst.msk [vmem:[#allocation2 + $0xd8] sm:$0xff] %vm988_vm4, %v947_v52  ;;  %v1098_v54 = vpop.permute.xlu2 %1097 }
 0x1cf   : > { %1017 = vst.msk [vmem:[#allocation2 + $0xe0] sm:$0xff] %vm988_vm4, %v949_v57  ;;  %v2248_v57 = vld [vmem:[%s2452_s16 + $0x81] sm:$0xff] }
 0x1d0   : > { %1188 = vst.msk [vmem:[#allocation2 + $0x30] sm:$0xff] %vm1181_vm5, %v1098_v54 }
 0x1d3   : > { %1496 = vrot.lane.b32.xlu0 %v2253_v3, %s2410_s23  ;;  %1528 = vrot.lane.b32.xlu1 %v3109_v28, %s2410_s23  ;;  %v2220_v28 = vld [vmem:[%s2452_s16 + $0xb0] sm:$0xff] }
 0x1d4   : > { %1689 = vrot.lane.b32.xlu2 %v2285_v39, %s2411_s24 }
 0x1d5   : > { %v953_v50 = vpop.permute.xlu0 %952  ;;  %v955_v48 = vpop.permute.xlu1 %954 }
 0x1d6   : > { %1019 = vst.msk [vmem:[#allocation2 + $0xf0] sm:$0xff] %vm988_vm4, %v953_v50  ;;  %v1104_v47 = vpop.permute.xlu2 %1103 }
 0x1d7   : > { %1020 = vst.msk [vmem:[#allocation2 + $0xf8] sm:$0xff] %vm988_vm4, %v955_v48  ;;  %v2264_v48 = vld [vmem:[%s2452_s16 + $0x141] sm:$0xff] }
 0x1d8   : > { %1191 = vst.msk [vmem:[#allocation2 + $0x48] sm:$0xff] %vm1181_vm5, %v1104_v47  ;;  %v2280_v47 = vld [vmem:[%s2452_s16 + $0x82] sm:$0xff] }
 0x1db   : > { %1721 = vrot.lane.b32.xlu0 %v3191_v20, %s2411_s24  ;;  %1139 = vrot.lane.b32.xlu1 %v3693_v37, %s2408_s21 }
 0x1dc   : > { %1301 = vrot.lane.b32.xlu2 %v2220_v28, %s2409_s22  ;;  %v2296_v28 = vld [vmem:[%s2452_s16 + $0x142] sm:$0xff] }
 0x1dd   : > { %v1088_v44 = vpop.permute.xlu0 %1087  ;;  %v1090_v36 = vpop.permute.xlu1 %1089 }
 0x1de   : > { %1183 = vst.msk [vmem:[#allocation2 + $0x8] sm:$0xff] %vm1181_vm5, %v1088_v44  ;;  %v1110_v45 = vpop.permute.xlu2 %1109 }
 0x1df   : > { %1184 = vst.msk [vmem:[#allocation2 + $0x10] sm:$0xff] %vm1181_vm5, %v1090_v36 }
 0x1e0   : > { %1194 = vst.msk [vmem:[#allocation2 + $0x60] sm:$0xff] %vm1181_vm5, %v1110_v45  ;;  %v2215_v45 = vld [vmem:[%s2452_s16 + $0x78] sm:$0xff] }
 0x1e3   : > { %1333 = vrot.lane.b32.xlu0 %v2914_v43, %s2409_s22  ;;  %1494 = vrot.lane.b32.xlu1 %v2252_v38, %s2410_s23  ;;  %v3279_v43 = vld [vmem:[%s2452_s16 + $0x152] sm:$0xff]  ;;  %v3374_v38 = vld [vmem:[%s2452_s16 + $0x122] sm:$0xff] }
 0x1e4   : > { %1526 = vrot.lane.b32.xlu2 %v2268_v46, %s2410_s23 }
 0x1e5   : > { %v1094_v51 = vpop.permute.xlu0 %1093  ;;  %v1096_v1 = vpop.permute.xlu1 %1095 }
 0x1e6   : > { %1186 = vst.msk [vmem:[#allocation2 + $0x20] sm:$0xff] %vm1181_vm5, %v1094_v51  ;;  %v1116_v2 = vpop.permute.xlu2 %1115  ;;  %v2231_v51 = vld [vmem:[%s2452_s16 + $0x138] sm:$0xff] }
 0x1e7   : > { %1187 = vst.msk [vmem:[#allocation2 + $0x28] sm:$0xff] %vm1181_vm5, %v1096_v1 }
 0x1e8   : > { %1197 = vst.msk [vmem:[#allocation2 + $0x78] sm:$0xff] %vm1181_vm5, %v1116_v2 }
 0x1eb   : > { %1687 = vrot.lane.b32.xlu0 %v2284_v4, %s2411_s24  ;;  %1719 = vrot.lane.b32.xlu1 %v3691_v62, %s2411_s24 }
 0x1ec   : > { %1137 = vrot.lane.b32.xlu2 %v3279_v43, %s2408_s21 }
 0x1ed   : > { %v1100_v5 = vpop.permute.xlu0 %1099  ;;  %v1102_v6 = vpop.permute.xlu1 %1101 }
 0x1ee   : > { %1189 = vst.msk [vmem:[#allocation2 + $0x38] sm:$0xff] %vm1181_vm5, %v1100_v5  ;;  %v1342_v8 = vpop.permute.xlu2 %1341  ;;  %v2247_v5 = vld [vmem:[%s2452_s16 + $0x79] sm:$0xff] }
 0x1ef   : > { %1190 = vst.msk [vmem:[#allocation2 + $0x40] sm:$0xff] %vm1181_vm5, %v1102_v6  ;;  %v2263_v6 = vld [vmem:[%s2452_s16 + $0x139] sm:$0xff] }
 0x1f3   : > { %1299 = vrot.lane.b32.xlu0 %v2219_v7, %s2409_s22  ;;  %1331 = vrot.lane.b32.xlu1 %v2897_v40, %s2409_s22 }
 0x1f4   : > { %1492 = vrot.lane.b32.xlu2 %v2251_v9, %s2410_s23 }
 0x1f5   : > { %v1106_v10 = vpop.permute.xlu0 %1105  ;;  %v1108_v11 = vpop.permute.xlu1 %1107 }
 0x1f6   : > { %1192 = vst.msk [vmem:[#allocation2 + $0x50] sm:$0xff] %vm1181_vm5, %v1106_v10  ;;  %v1696_v14 = vpop.permute.xlu2 %1695 }
 0x1f7   : > { %1193 = vst.msk [vmem:[#allocation2 + $0x58] sm:$0xff] %vm1181_vm5, %v1108_v11  ;;  %v3399_v11 = vld [vmem:[%s2452_s16 + $0x112] sm:$0xff] }
 0x1fb   : > { %1524 = vrot.lane.b32.xlu0 %v2267_v12, %s2410_s23  ;;  %1685 = vrot.lane.b32.xlu1 %v2283_v13, %s2411_s24  ;;  %v2214_v13 = vld [vmem:[%s2452_s16 + $0x68] sm:$0xff] }
 0x1fc   : > { %1717 = vrot.lane.b32.xlu2 %v3692_v63, %s2411_s24  ;;  %v2232_v63 = vld [vmem:[%s2452_s16 + $0x140] sm:$0xff] }
 0x1fd   : > { %v1112_v15 = vpop.permute.xlu0 %1111  ;;  %v1114_v40 = vpop.permute.xlu1 %1113 }
 0x1fe   : > { %1195 = vst.msk [vmem:[#allocation2 + $0x68] sm:$0xff] %vm1181_vm5, %v1112_v15  ;;  %v1308_v32 = vpop.permute.xlu2 %1307 }
 0x1ff   : > { %1196 = vst.msk [vmem:[#allocation2 + $0x70] sm:$0xff] %vm1181_vm5, %v1114_v40 }
 0x200   : > { %1390 = vst.msk [vmem:[#allocation2 + $0x70] sm:$0xff] %vm1375_vm6, %v1308_v32  ;;  %v2246_v32 = vld [vmem:[%s2452_s16 + $0x69] sm:$0xff] }
 0x203   : > { %1135 = vrot.lane.b32.xlu0 %v3694_v17, %s2408_s21  ;;  %1297 = vrot.lane.b32.xlu1 %v2218_v16, %s2409_s22  ;;  %v2230_v16 = vld [vmem:[%s2452_s16 + $0x128] sm:$0xff] }
 0x204   : > { %1329 = vrot.lane.b32.xlu2 %v2234_v18, %s2409_s22  ;;  %v2262_v18 = vld [vmem:[%s2452_s16 + $0x129] sm:$0xff] }
 0x205   : > { %v1148_v19 = vpop.permute.xlu0 %1147  ;;  %v1310_v20 = vpop.permute.xlu1 %1309 }
 0x206   : > { %1213 = vst.msk [vmem:[#allocation2 + $0xf8] sm:$0xff] %vm1181_vm5, %v1148_v19  ;;  %v1533_v23 = vpop.permute.xlu2 %1532 }
 0x207   : > { %1391 = vst.msk [vmem:[#allocation2 + $0x78] sm:$0xff] %vm1375_vm6, %v1310_v20 }
 0x208   : > { %1407 = vst.msk [vmem:[#allocation2 + $0xf8] sm:$0xff] %vm1375_vm6, %v1342_v8  ;;  %v2279_v8 = vld [vmem:[%s2452_s16 + $0x7a] sm:$0xff] }
 0x20b   : > { %1490 = vrot.lane.b32.xlu0 %v2250_v21, %s2410_s23  ;;  %1522 = vrot.lane.b32.xlu1 %v2266_v22, %s2410_s23  ;;  %v2278_v22 = vld [vmem:[%s2452_s16 + $0x6a] sm:$0xff] }
 0x20c   : > { %1683 = vrot.lane.b32.xlu2 %v2282_v24, %s2411_s24  ;;  %v3426_v24 = vld [vmem:[%s2452_s16 + $0x10a] sm:$0xff] }
 0x20d   : > { %v1503_v25 = vpop.permute.xlu0 %1502  ;;  %v1535_v26 = vpop.permute.xlu1 %1534 }
 0x20e   : > { %1584 = vst.msk [vmem:[#allocation2 + $0x78] sm:$0xff] %vm1568_vm7, %v1503_v25  ;;  %v1144_v29 = vpop.permute.xlu2 %1143 }
 0x20f   : > { %1600 = vst.msk [vmem:[#allocation2 + $0xf8] sm:$0xff] %vm1568_vm7, %v1535_v26 }
 0x210   : > { %1777 = vst.msk [vmem:[#allocation2 + $0x78] sm:$0xff] %vm1761_vm8, %v1696_v14 }
 0x211   : > { %1211 = vst.msk [vmem:[#allocation2 + $0xe8] sm:$0xff] %vm1181_vm5, %v1144_v29 }
 0x213   : > { %1715 = vrot.lane.b32.xlu0 %v2298_v27, %s2411_s24  ;;  %1133 = vrot.lane.b32.xlu1 %v3322_v53, %s2408_s21  ;;  %v2213_v27 = vld [vmem:[%s2452_s16 + $0x60] sm:$0xff] }
 0x214   : > { %1295 = vrot.lane.b32.xlu2 %v2217_v0, %s2409_s22  ;;  %v2245_v0 = vld [vmem:[%s2452_s16 + $0x61] sm:$0xff] }
 0x215   : > { %v1728_v30 = vpop.permute.xlu0 %1727  ;;  %v1146_v31 = vpop.permute.xlu1 %1145 }
 0x216   : > { %1793 = vst.msk [vmem:[#allocation2 + $0xf8] sm:$0xff] %vm1761_vm8, %v1728_v30  ;;  %v1499_v62 = vpop.permute.xlu2 %1498 }
 0x217   : > { %1212 = vst.msk [vmem:[#allocation2 + $0xf0] sm:$0xff] %vm1181_vm5, %v1146_v31  ;;  %v1810_v58 = vld [vmem:[#allocation2 + $0x78] sm:$0xff] }
 0x218   : > { %2305 = vmatpush.xpose.msk.msra.mxu0 %vm1827_vm9, %v1810_v58 }
 0x21b   : > { %1327 = vrot.lane.b32.xlu0 %v2887_v55, %s2409_s22  ;;  %1488 = vrot.lane.b32.xlu1 %v2249_v59, %s2410_s23 }
 0x21c   : > { %1520 = vrot.lane.b32.xlu2 %v2265_v33, %s2410_s23  ;;  %v2277_v33 = vld [vmem:[%s2452_s16 + $0x62] sm:$0xff] }
 0x21d   : > { %v1340_v34 = vpop.permute.xlu0 %1339  ;;  %v1826_v49 = vld [vmem:[#allocation2 + $0xf8] sm:$0xff]  ;;  %v1501_v60 = vpop.permute.xlu1 %1500 }
 0x21e   : > { %1406 = vst.msk [vmem:[#allocation2 + $0xf0] sm:$0xff] %vm1375_vm6, %v1340_v34  ;;  %2322 = vmatpush.xpose.msk.msra.mxu1 %vm1827_vm9, %v1826_v49  ;;  %v1724_v55 = vpop.permute.xlu2 %1723 }
 0x21f   : > { %1583 = vst.msk [vmem:[#allocation2 + $0x70] sm:$0xff] %vm1568_vm7, %v1501_v60 }
 0x220   : > { %1599 = vst.msk [vmem:[#allocation2 + $0xf0] sm:$0xff] %vm1568_vm7, %v1533_v23 }
 0x223   : > { %1681 = vrot.lane.b32.xlu0 %v2281_v35, %s2411_s24  ;;  %1713 = vrot.lane.b32.xlu1 %v3279_v43, %s2411_s24  ;;  %v3452_v35 = vld [vmem:[%s2452_s16 + $0xfa] sm:$0xff] }
 0x224   : > { %1131 = vrot.lane.b32.xlu2 %v3348_v56, %s2408_s21 }
 0x225   : > { %v1694_v42 = vpop.permute.xlu0 %1693  ;;  %v1726_v41 = vpop.permute.xlu1 %1725 }
 0x226   : > { %1776 = vst.msk [vmem:[#allocation2 + $0x70] sm:$0xff] %vm1761_vm8, %v1694_v42  ;;  %v1336_v52 = vpop.permute.xlu2 %1335  ;;  %v2228_v42 = vld [vmem:[%s2452_s16 + $0x110] sm:$0xff] }
 0x227   : > { %1792 = vst.msk [vmem:[#allocation2 + $0xf0] sm:$0xff] %vm1761_vm8, %v1726_v41 }
 0x22b   : > { %1293 = vrot.lane.b32.xlu0 %v2216_v61, %s2409_s22  ;;  %1325 = vrot.lane.b32.xlu1 %v2232_v63, %s2409_s22 }
 0x22c   : > { %1486 = vrot.lane.b32.xlu2 %v2248_v57, %s2410_s23  ;;  %v2244_v57 = vld [vmem:[%s2452_s16 + $0x51] sm:$0xff] }
 0x22d   : > { %v1306_v3 = vpop.permute.xlu0 %1305  ;;  %v1809_v54 = vld [vmem:[#allocation2 + $0x70] sm:$0xff]  ;;  %v1338_v39 = vpop.permute.xlu1 %1337 }
 0x22e   : > { %1389 = vst.msk [vmem:[#allocation2 + $0x68] sm:$0xff] %vm1375_vm6, %v1306_v3  ;;  %2306 = vmatpush.xpose.msk.msra.mxu0 %vm1827_vm9, %v1809_v54  ;;  %v1825_v50 = vld [vmem:[#allocation2 + $0xf0] sm:$0xff]  ;;  %v1690_v37 = vpop.permute.xlu2 %1689 }
 0x22f   : > { %1405 = vst.msk [vmem:[#allocation2 + $0xe8] sm:$0xff] %vm1375_vm6, %v1338_v39  ;;  %2323 = vmatpush.xpose.msk.msra.mxu1 %vm1827_vm9, %v1825_v50  ;;  %v2260_v3 = vld [vmem:[%s2452_s16 + $0x111] sm:$0xff] }
 0x230   : > { %1582 = vst.msk [vmem:[#allocation2 + $0x68] sm:$0xff] %vm1568_vm7, %v1499_v62  ;;  %v2261_v62 = vld [vmem:[%s2452_s16 + $0x121] sm:$0xff]  ;;  %v2276_v39 = vld [vmem:[%s2452_s16 + $0x52] sm:$0xff] }
 0x233   : > { %1518 = vrot.lane.b32.xlu0 %v2264_v48, %s2410_s23  ;;  %1679 = vrot.lane.b32.xlu1 %v2280_v47, %s2411_s24  ;;  %v3477_v47 = vld [vmem:[%s2452_s16 + $0xf2] sm:$0xff] }
 0x234   : > { %1711 = vrot.lane.b32.xlu2 %v2296_v28, %s2411_s24  ;;  %v2211_v28 = vld [vmem:[%s2452_s16 + $0x48] sm:$0xff] }
 0x235   : > { %v1531_v44 = vpop.permute.xlu0 %1530  ;;  %v1692_v36 = vpop.permute.xlu1 %1691 }
 0x236   : > { %1598 = vst.msk [vmem:[#allocation2 + $0xe8] sm:$0xff] %vm1568_vm7, %v1531_v44  ;;  %v1302_v46 = vpop.permute.xlu2 %1301 }
 0x237   : > { %1775 = vst.msk [vmem:[#allocation2 + $0x68] sm:$0xff] %vm1761_vm8, %v1692_v36 }
 0x238   : > { %1791 = vst.msk [vmem:[#allocation2 + $0xe8] sm:$0xff] %vm1761_vm8, %v1724_v55  ;;  %v2212_v55 = vld [vmem:[%s2452_s16 + $0x50] sm:$0xff] }
 0x239   : > { %1387 = vst.msk [vmem:[#allocation2 + $0x58] sm:$0xff] %vm1375_vm6, %v1302_v46  ;;  %v2243_v46 = vld [vmem:[%s2452_s16 + $0x49] sm:$0xff] }
 0x23b   : > { %1129 = vrot.lane.b32.xlu0 %v3374_v38, %s2408_s21  ;;  %1291 = vrot.lane.b32.xlu1 %v2215_v45, %s2409_s22  ;;  %v2227_v45 = vld [vmem:[%s2452_s16 + $0x108] sm:$0xff] }
 0x23c   : > { %1323 = vrot.lane.b32.xlu2 %v2231_v51, %s2409_s22 }
 0x23d   : > { %v1142_v1 = vpop.permute.xlu0 %1141  ;;  %v1304_v4 = vpop.permute.xlu1 %1303 }
 0x23e   : > { %1210 = vst.msk [vmem:[#allocation2 + $0xe0] sm:$0xff] %vm1181_vm5, %v1142_v1  ;;  %v1808_v2 = vld [vmem:[#allocation2 + $0x68] sm:$0xff]  ;;  %v1527_v7 = vpop.permute.xlu2 %1526 }
 0x23f   : > { %1388 = vst.msk [vmem:[#allocation2 + $0x60] sm:$0xff] %vm1375_vm6, %v1304_v4  ;;  %2307 = vmatpush.xpose.msk.msra.mxu0 %vm1827_vm9, %v1808_v2  ;;  %v1824_v43 = vld [vmem:[#allocation2 + $0xe8] sm:$0xff] }
 0x240   : > { %1404 = vst.msk [vmem:[#allocation2 + $0xe0] sm:$0xff] %vm1375_vm6, %v1336_v52  ;;  %2324 = vmatpush.xpose.msk.msra.mxu1 %vm1827_vm9, %v1824_v43  ;;  %v2259_v1 = vld [vmem:[%s2452_s16 + $0x109] sm:$0xff] }
 0x243   : > { %1484 = vrot.lane.b32.xlu0 %v2247_v5, %s2410_s23  ;;  %1516 = vrot.lane.b32.xlu1 %v2263_v6, %s2410_s23  ;;  %v2275_v5 = vld [vmem:[%s2452_s16 + $0x4a] sm:$0xff] }
 0x244   : > { %1677 = vrot.lane.b32.xlu2 %v2279_v8, %s2411_s24 }
 0x245   : > { %v1497_v9 = vpop.permute.xlu0 %1496  ;;  %v1529_v10 = vpop.permute.xlu1 %1528 }
 0x246   : > { %1581 = vst.msk [vmem:[#allocation2 + $0x60] sm:$0xff] %vm1568_vm7, %v1497_v9  ;;  %v1138_v12 = vpop.permute.xlu2 %1137 }
 0x247   : > { %1597 = vst.msk [vmem:[#allocation2 + $0xe0] sm:$0xff] %vm1568_vm7, %v1529_v10  ;;  %v2210_v10 = vld [vmem:[%s2452_s16 + $0x38] sm:$0xff] }
 0x248   : > { %1774 = vst.msk [vmem:[#allocation2 + $0x60] sm:$0xff] %vm1761_vm8, %v1690_v37 }
 0x249   : > { %1208 = vst.msk [vmem:[#allocation2 + $0xd0] sm:$0xff] %vm1181_vm5, %v1138_v12 }
 0x24b   : > { %1709 = vrot.lane.b32.xlu0 %v3322_v53, %s2411_s24  ;;  %1127 = vrot.lane.b32.xlu1 %v3399_v11, %s2408_s21  ;;  %v2229_v53 = vld [vmem:[%s2452_s16 + $0x120] sm:$0xff] }
 0x24c   : > { %1289 = vrot.lane.b32.xlu2 %v2214_v13, %s2409_s22  ;;  %v2242_v13 = vld [vmem:[%s2452_s16 + $0x39] sm:$0xff] }
 0x24d   : > { %v1722_v14 = vpop.permute.xlu0 %1721  ;;  %v1140_v15 = vpop.permute.xlu1 %1139 }
 0x24e   : > { %1790 = vst.msk [vmem:[#allocation2 + $0xe0] sm:$0xff] %vm1761_vm8, %v1722_v14  ;;  %v1493_v17 = vpop.permute.xlu2 %1492 }
 0x24f   : > { %1209 = vst.msk [vmem:[#allocation2 + $0xd8] sm:$0xff] %vm1181_vm5, %v1140_v15  ;;  %v1807_v40 = vld [vmem:[#allocation2 + $0x60] sm:$0xff] }
 0x250   : > { %2308 = vmatpush.xpose.msk.msra.mxu0 %vm1827_vm9, %v1807_v40 }
 0x253   : > { %1321 = vrot.lane.b32.xlu0 %v2230_v16, %s2409_s22  ;;  %1482 = vrot.lane.b32.xlu1 %v2246_v32, %s2410_s23  ;;  %v2258_v32 = vld [vmem:[%s2452_s16 + $0xf9] sm:$0xff] }
 0x254   : > { %1514 = vrot.lane.b32.xlu2 %v2262_v18, %s2410_s23 }
 0x255   : > { %v1334_v19 = vpop.permute.xlu0 %1333  ;;  %v1823_v20 = vld [vmem:[#allocation2 + $0xe0] sm:$0xff]  ;;  %v1495_v21 = vpop.permute.xlu1 %1494 }
 0x256   : > { %1403 = vst.msk [vmem:[#allocation2 + $0xd8] sm:$0xff] %vm1375_vm6, %v1334_v19  ;;  %2325 = vmatpush.xpose.msk.msra.mxu1 %vm1827_vm9, %v1823_v20  ;;  %v1718_v23 = vpop.permute.xlu2 %1717 }
 0x257   : > { %1580 = vst.msk [vmem:[#allocation2 + $0x58] sm:$0xff] %vm1568_vm7, %v1495_v21  ;;  %v2193_v21 = vld [vmem:[%s2452_s16 + $0xda] sm:$0xff] }
 0x258   : > { %1596 = vst.msk [vmem:[#allocation2 + $0xd8] sm:$0xff] %vm1568_vm7, %v1527_v7  ;;  %v2194_v7 = vld [vmem:[%s2452_s16 + $0xe2] sm:$0xff] }
 0x25b   : > { %1675 = vrot.lane.b32.xlu0 %v2278_v22, %s2411_s24  ;;  %1707 = vrot.lane.b32.xlu1 %v3348_v56, %s2411_s24  ;;  %v2209_v22 = vld [vmem:[%s2452_s16 + $0x30] sm:$0xff] }
 0x25c   : > { %1125 = vrot.lane.b32.xlu2 %v3426_v24, %s2408_s21 }
 0x25d   : > { %v1688_v25 = vpop.permute.xlu0 %1687  ;;  %v1720_v26 = vpop.permute.xlu1 %1719 }
 0x25e   : > { %1773 = vst.msk [vmem:[#allocation2 + $0x58] sm:$0xff] %vm1761_vm8, %v1688_v25  ;;  %v1330_v29 = vpop.permute.xlu2 %1329 }
 0x25f   : > { %1789 = vst.msk [vmem:[#allocation2 + $0xd8] sm:$0xff] %vm1761_vm8, %v1720_v26 }
 0x263   : > { %1287 = vrot.lane.b32.xlu0 %v2213_v27, %s2409_s22  ;;  %1319 = vrot.lane.b32.xlu1 %v2229_v53, %s2409_s22 }
 0x264   : > { %1480 = vrot.lane.b32.xlu2 %v2245_v0, %s2410_s23  ;;  %v2257_v0 = vld [vmem:[%s2452_s16 + $0xf1] sm:$0xff] }
 0x265   : > { %v1300_v30 = vpop.permute.xlu0 %1299  ;;  %v1806_v31 = vld [vmem:[#allocation2 + $0x58] sm:$0xff]  ;;  %v1332_v58 = vpop.permute.xlu1 %1331 }
 0x266   : > { %1386 = vst.msk [vmem:[#allocation2 + $0x50] sm:$0xff] %vm1375_vm6, %v1300_v30  ;;  %2309 = vmatpush.xpose.msk.msra.mxu0 %vm1827_vm9, %v1806_v31  ;;  %v1822_v59 = vld [vmem:[#allocation2 + $0xd8] sm:$0xff]  ;;  %v1684_v34 = vpop.permute.xlu2 %1683 }
 0x267   : > { %1402 = vst.msk [vmem:[#allocation2 + $0xd0] sm:$0xff] %vm1375_vm6, %v1332_v58  ;;  %2326 = vmatpush.xpose.msk.msra.mxu1 %vm1827_vm9, %v1822_v59  ;;  %v2273_v31 = vld [vmem:[%s2452_s16 + $0x32] sm:$0xff] }
 0x268   : > { %1579 = vst.msk [vmem:[#allocation2 + $0x50] sm:$0xff] %vm1568_vm7, %v1493_v17  ;;  %v2274_v17 = vld [vmem:[%s2452_s16 + $0x3a] sm:$0xff] }
 0x26b   : > { %1512 = vrot.lane.b32.xlu0 %v2261_v62, %s2410_s23  ;;  %1673 = vrot.lane.b32.xlu1 %v2277_v33, %s2411_s24 }
 0x26c   : > { %1705 = vrot.lane.b32.xlu2 %v3374_v38, %s2411_s24 }
 0x26d   : > { %v1525_v49 = vpop.permute.xlu0 %1524  ;;  %v1686_v60 = vpop.permute.xlu1 %1685 }
 0x26e   : > { %1595 = vst.msk [vmem:[#allocation2 + $0xd0] sm:$0xff] %vm1568_vm7, %v1525_v49  ;;  %v1296_v56 = vpop.permute.xlu2 %1295 }
 0x26f   : > { %1772 = vst.msk [vmem:[#allocation2 + $0x50] sm:$0xff] %vm1761_vm8, %v1686_v60 }
 0x270   : > { %1788 = vst.msk [vmem:[#allocation2 + $0xd0] sm:$0xff] %vm1761_vm8, %v1718_v23 }
 0x271   : > { %1384 = vst.msk [vmem:[#allocation2 + $0x40] sm:$0xff] %vm1375_vm6, %v1296_v56 }
 0x273   : > { %1123 = vrot.lane.b32.xlu0 %v3452_v35, %s2408_s21  ;;  %1285 = vrot.lane.b32.xlu1 %v2212_v55, %s2409_s22 }
 0x274   : > { %1317 = vrot.lane.b32.xlu2 %v2228_v42, %s2409_s22 }
 0x275   : > { %v1136_v41 = vpop.permute.xlu0 %1135  ;;  %v1298_v61 = vpop.permute.xlu1 %1297 }
 0x276   : > { %1207 = vst.msk [vmem:[#allocation2 + $0xc8] sm:$0xff] %vm1181_vm5, %v1136_v41  ;;  %v1805_v63 = vld [vmem:[#allocation2 + $0x50] sm:$0xff]  ;;  %v1521_v54 = vpop.permute.xlu2 %1520 }
 0x277   : > { %1385 = vst.msk [vmem:[#allocation2 + $0x48] sm:$0xff] %vm1375_vm6, %v1298_v61  ;;  %2310 = vmatpush.xpose.msk.msra.mxu0 %vm1827_vm9, %v1805_v63  ;;  %v1821_v52 = vld [vmem:[#allocation2 + $0xd0] sm:$0xff] }
 0x278   : > { %1401 = vst.msk [vmem:[#allocation2 + $0xc8] sm:$0xff] %vm1375_vm6, %v1330_v29  ;;  %2327 = vmatpush.xpose.msk.msra.mxu1 %vm1827_vm9, %v1821_v52  ;;  %v2241_v29 = vld [vmem:[%s2452_s16 + $0x31] sm:$0xff] }
 0x27b   : > { %1478 = vrot.lane.b32.xlu0 %v2244_v57, %s2410_s23  ;;  %1510 = vrot.lane.b32.xlu1 %v2260_v3, %s2410_s23 }
 0x27c   : > { %1671 = vrot.lane.b32.xlu2 %v2276_v39, %s2411_s24 }
 0x27d   : > { %v1491_v50 = vpop.permute.xlu0 %1490  ;;  %v1523_v48 = vpop.permute.xlu1 %1522 }
 0x27e   : > { %1578 = vst.msk [vmem:[#allocation2 + $0x48] sm:$0xff] %vm1568_vm7, %v1491_v50  ;;  %v1132_v37 = vpop.permute.xlu2 %1131 }
 0x27f   : > { %1594 = vst.msk [vmem:[#allocation2 + $0xc8] sm:$0xff] %vm1568_vm7, %v1523_v48 }
 0x280   : > { %1771 = vst.msk [vmem:[#allocation2 + $0x48] sm:$0xff] %vm1761_vm8, %v1684_v34 }
 0x281   : > { %1205 = vst.msk [vmem:[#allocation2 + $0xb8] sm:$0xff] %vm1181_vm5, %v1132_v37 }
 0x283   : > { %1703 = vrot.lane.b32.xlu0 %v3399_v11, %s2411_s24  ;;  %1121 = vrot.lane.b32.xlu1 %v3477_v47, %s2408_s21  ;;  %v2226_v11 = vld [vmem:[%s2452_s16 + $0xf8] sm:$0xff] }
 0x284   : > { %1283 = vrot.lane.b32.xlu2 %v2211_v28, %s2409_s22 }
 0x285   : > { %v1716_v44 = vpop.permute.xlu0 %1715  ;;  %v1134_v36 = vpop.permute.xlu1 %1133 }
 0x286   : > { %1787 = vst.msk [vmem:[#allocation2 + $0xc8] sm:$0xff] %vm1761_vm8, %v1716_v44  ;;  %v1487_v51 = vpop.permute.xlu2 %1486 }
 0x287   : > { %1206 = vst.msk [vmem:[#allocation2 + $0xc0] sm:$0xff] %vm1181_vm5, %v1134_v36  ;;  %v1804_v38 = vld [vmem:[#allocation2 + $0x48] sm:$0xff] }
 0x288   : > { %2311 = vmatpush.xpose.msk.msra.mxu0 %vm1827_vm9, %v1804_v38 }
 0x28b   : > { %1315 = vrot.lane.b32.xlu0 %v2227_v45, %s2409_s22  ;;  %1476 = vrot.lane.b32.xlu1 %v2243_v46, %s2410_s23 }
 0x28c   : > { %1508 = vrot.lane.b32.xlu2 %v2259_v1, %s2410_s23 }
 0x28d   : > { %v1328_v4 = vpop.permute.xlu0 %1327  ;;  %v1820_v2 = vld [vmem:[#allocation2 + $0xc8] sm:$0xff]  ;;  %v1489_v43 = vpop.permute.xlu1 %1488 }
 0x28e   : > { %1400 = vst.msk [vmem:[#allocation2 + $0xc0] sm:$0xff] %vm1375_vm6, %v1328_v4  ;;  %2328 = vmatpush.xpose.msk.msra.mxu1 %vm1827_vm9, %v1820_v2  ;;  %v1712_v6 = vpop.permute.xlu2 %1711 }
 0x28f   : > { %1577 = vst.msk [vmem:[#allocation2 + $0x40] sm:$0xff] %vm1568_vm7, %v1489_v43 }
 0x290   : > { %1593 = vst.msk [vmem:[#allocation2 + $0xc0] sm:$0xff] %vm1568_vm7, %v1521_v54 }
 0x293   : > { %1669 = vrot.lane.b32.xlu0 %v2275_v5, %s2411_s24  ;;  %1701 = vrot.lane.b32.xlu1 %v3426_v24, %s2411_s24  ;;  %v2225_v24 = vld [vmem:[%s2452_s16 + $0xf0] sm:$0xff] }
 0x294   : > { %1119 = vrot.lane.b32.xlu2 %v2194_v7, %s2408_s21 }
 0x295   : > { %v1682_v8 = vpop.permute.xlu0 %1681  ;;  %v1714_v9 = vpop.permute.xlu1 %1713 }
 0x296   : > { %1770 = vst.msk [vmem:[#allocation2 + $0x40] sm:$0xff] %vm1761_vm8, %v1682_v8  ;;  %v1324_v12 = vpop.permute.xlu2 %1323 }
 0x297   : > { %1786 = vst.msk [vmem:[#allocation2 + $0xc0] sm:$0xff] %vm1761_vm8, %v1714_v9 }
 0x29b   : > { %1281 = vrot.lane.b32.xlu0 %v2210_v10, %s2409_s22  ;;  %1313 = vrot.lane.b32.xlu1 %v2226_v11, %s2409_s22 }
 0x29c   : > { %1474 = vrot.lane.b32.xlu2 %v2242_v13, %s2410_s23 }
 0x29d   : > { %v1294_v14 = vpop.permute.xlu0 %1293  ;;  %v1803_v15 = vld [vmem:[#allocation2 + $0x40] sm:$0xff]  ;;  %v1326_v40 = vpop.permute.xlu1 %1325 }
 0x29e   : > { %1383 = vst.msk [vmem:[#allocation2 + $0x38] sm:$0xff] %vm1375_vm6, %v1294_v14  ;;  %2312 = vmatpush.xpose.msk.msra.mxu0 %vm1827_vm9, %v1803_v15  ;;  %v1819_v16 = vld [vmem:[#allocation2 + $0xc0] sm:$0xff]  ;;  %v1678_v18 = vpop.permute.xlu2 %1677 }
 0x29f   : > { %1399 = vst.msk [vmem:[#allocation2 + $0xb8] sm:$0xff] %vm1375_vm6, %v1326_v40  ;;  %2329 = vmatpush.xpose.msk.msra.mxu1 %vm1827_vm9, %v1819_v16 }
 0x2a0   : > { %1576 = vst.msk [vmem:[#allocation2 + $0x38] sm:$0xff] %vm1568_vm7, %v1487_v51 }
 0x2a3   : > { %1506 = vrot.lane.b32.xlu0 %v2258_v32, %s2410_s23  ;;  %1667 = vrot.lane.b32.xlu1 %v2274_v17, %s2411_s24 }
 0x2a4   : > { %1699 = vrot.lane.b32.xlu2 %v3452_v35, %s2411_s24 }
 0x2a5   : > { %v1519_v19 = vpop.permute.xlu0 %1518  ;;  %v1680_v20 = vpop.permute.xlu1 %1679 }
 0x2a6   : > { %1592 = vst.msk [vmem:[#allocation2 + $0xb8] sm:$0xff] %vm1568_vm7, %v1519_v19  ;;  %v1290_v23 = vpop.permute.xlu2 %1289 }
 0x2a7   : > { %1769 = vst.msk [vmem:[#allocation2 + $0x38] sm:$0xff] %vm1761_vm8, %v1680_v20 }
 0x2a8   : > { %1785 = vst.msk [vmem:[#allocation2 + $0xb8] sm:$0xff] %vm1761_vm8, %v1712_v6 }
 0x2a9   : > { %1381 = vst.msk [vmem:[#allocation2 + $0x28] sm:$0xff] %vm1375_vm6, %v1290_v23 }
 0x2ab   : > { %1117 = vrot.lane.b32.xlu0 %v2193_v21, %s2408_s21  ;;  %1279 = vrot.lane.b32.xlu1 %v2209_v22, %s2409_s22 }
 0x2ac   : > { %1311 = vrot.lane.b32.xlu2 %v2225_v24, %s2409_s22 }
 0x2ad   : > { %v1130_v25 = vpop.permute.xlu0 %1129  ;;  %v1292_v26 = vpop.permute.xlu1 %1291 }
 0x2ae   : > { %1204 = vst.msk [vmem:[#allocation2 + $0xb0] sm:$0xff] %vm1181_vm5, %v1130_v25  ;;  %v1802_v27 = vld [vmem:[#allocation2 + $0x38] sm:$0xff]  ;;  %v1515_v30 = vpop.permute.xlu2 %1514  ;;  %v1794_v25 = vld [vmem:[%s3625_s1] sm:$0xff] }
 0x2af   : > { %1382 = vst.msk [vmem:[#allocation2 + $0x30] sm:$0xff] %vm1375_vm6, %v1292_v26  ;;  %2313 = vmatpush.xpose.msk.msra.mxu0 %vm1827_vm9, %v1802_v27  ;;  %v1818_v53 = vld [vmem:[#allocation2 + $0xb8] sm:$0xff] }
 0x2b0   : > { %1398 = vst.msk [vmem:[#allocation2 + $0xb0] sm:$0xff] %vm1375_vm6, %v1324_v12  ;;  %2330 = vmatpush.xpose.msk.msra.mxu1 %vm1827_vm9, %v1818_v53 }
 0x2b3   : > { %1472 = vrot.lane.b32.xlu0 %v2241_v29, %s2410_s23  ;;  %1504 = vrot.lane.b32.xlu1 %v2257_v0, %s2410_s23  ;;  %v2412_v0 = vmov 256.0  }
 0x2b4   : > { %1665 = vrot.lane.b32.xlu2 %v2273_v31, %s2411_s24  ;;  %2376 = vrcp.f32 %v2412_v0 }
 0x2b5   : > { %v1485_v58 = vpop.permute.xlu0 %1484  ;;  %v1517_v59 = vpop.permute.xlu1 %1516 }
 0x2b6   : > { %1575 = vst.msk [vmem:[#allocation2 + $0x30] sm:$0xff] %vm1568_vm7, %v1485_v58  ;;  %v1126_v62 = vpop.permute.xlu2 %1125 }
 0x2b7   : > { %1591 = vst.msk [vmem:[#allocation2 + $0xb0] sm:$0xff] %vm1568_vm7, %v1517_v59 }
 0x2b8   : > { %1768 = vst.msk [vmem:[#allocation2 + $0x30] sm:$0xff] %vm1761_vm8, %v1678_v18 }
 0x2b9   : > { %1202 = vst.msk [vmem:[#allocation2 + $0xa0] sm:$0xff] %vm1181_vm5, %v1126_v62 }
 0x2bb   : > { %1697 = vrot.lane.b32.xlu0 %v3477_v47, %s2411_s24 }
 0x2bd   : > { %v1710_v33 = vpop.permute.xlu0 %1709  ;;  %v1128_v34 = vpop.permute.xlu1 %1127 }
 0x2be   : > { %1784 = vst.msk [vmem:[#allocation2 + $0xb0] sm:$0xff] %vm1761_vm8, %v1710_v33  ;;  %v1481_v60 = vpop.permute.xlu2 %1480 }
 0x2bf   : > { %1203 = vst.msk [vmem:[#allocation2 + $0xa8] sm:$0xff] %vm1181_vm5, %v1128_v34  ;;  %v1801_v49 = vld [vmem:[#allocation2 + $0x30] sm:$0xff] }
 0x2c0   : > { %2314 = vmatpush.xpose.msk.msra.mxu0 %vm1827_vm9, %v1801_v49 }
 0x2c5   : > { %v1322_v35 = vpop.permute.xlu0 %1321  ;;  %v1817_v55 = vld [vmem:[#allocation2 + $0xb0] sm:$0xff]  ;;  %v1483_v56 = vpop.permute.xlu1 %1482 }
 0x2c6   : > { %1397 = vst.msk [vmem:[#allocation2 + $0xa8] sm:$0xff] %vm1375_vm6, %v1322_v35  ;;  %2331 = vmatpush.xpose.msk.msra.mxu1 %vm1827_vm9, %v1817_v55  ;;  %v1706_v42 = vpop.permute.xlu2 %1705 }
 0x2c7   : > { %1574 = vst.msk [vmem:[#allocation2 + $0x28] sm:$0xff] %vm1568_vm7, %v1483_v56 }
 0x2c8   : > { %1590 = vst.msk [vmem:[#allocation2 + $0xa8] sm:$0xff] %vm1568_vm7, %v1515_v30  ;;  %v2377_v30 = vpop.eup %2376 }
 0x2c9   : > { %v1971_v31 = vmul.f32 256.0, %v2377_v30  ;;  %vm1975_vm10 = vweird.f32 %v2377_v30 }
 0x2cb   : > { %v1972_v58 = vsub.f32 1.0, %v1971_v31 }
 0x2cd   : > { %v1676_v41 = vpop.permute.xlu0 %1675  ;;  %v1708_v61 = vpop.permute.xlu1 %1707  ;;  %v1973_v59 = vmul.f32 %v2377_v30, %v1972_v58 }
 0x2ce   : > { %1767 = vst.msk [vmem:[#allocation2 + $0x28] sm:$0xff] %vm1761_vm8, %v1676_v41  ;;  %v1318_v63 = vpop.permute.xlu2 %1317 }
 0x2cf   : > { %1783 = vst.msk [vmem:[#allocation2 + $0xa8] sm:$0xff] %vm1761_vm8, %v1708_v61  ;;  %v1974_v62 = vadd.f32 %v2377_v30, %v1973_v59 }
 0x2d1   : > { %v1976_v33 = vsel %vm1975_vm10, %v2377_v30, %v1974_v62 }
 0x2d5   : > { %v1288_v52 = vpop.permute.xlu0 %1287  ;;  %v1800_v57 = vld [vmem:[#allocation2 + $0x28] sm:$0xff]  ;;  %v1320_v3 = vpop.permute.xlu1 %1319 }
 0x2d6   : > { %1380 = vst.msk [vmem:[#allocation2 + $0x20] sm:$0xff] %vm1375_vm6, %v1288_v52  ;;  %2315 = vmatpush.xpose.msk.msra.mxu0 %vm1827_vm9, %v1800_v57  ;;  %v1816_v54 = vld [vmem:[#allocation2 + $0xa8] sm:$0xff]  ;;  %v1672_v39 = vpop.permute.xlu2 %1671 }
 0x2d7   : > { %1396 = vst.msk [vmem:[#allocation2 + $0xa0] sm:$0xff] %vm1375_vm6, %v1320_v3  ;;  %2332 = vmatpush.xpose.msk.msra.mxu1 %vm1827_vm9, %v1816_v54 }
 0x2d8   : > { %1573 = vst.msk [vmem:[#allocation2 + $0x20] sm:$0xff] %vm1568_vm7, %v1481_v60 }
 0x2dd   : > { %v1513_v50 = vpop.permute.xlu0 %1512  ;;  %v1674_v48 = vpop.permute.xlu1 %1673 }
 0x2de   : > { %1589 = vst.msk [vmem:[#allocation2 + $0xa0] sm:$0xff] %vm1568_vm7, %v1513_v50  ;;  %v1284_v47 = vpop.permute.xlu2 %1283 }
 0x2df   : > { %1766 = vst.msk [vmem:[#allocation2 + $0x20] sm:$0xff] %vm1761_vm8, %v1674_v48 }
 0x2e0   : > { %1782 = vst.msk [vmem:[#allocation2 + $0xa0] sm:$0xff] %vm1761_vm8, %v1706_v42 }
 0x2e1   : > { %1378 = vst.msk [vmem:[#allocation2 + $0x10] sm:$0xff] %vm1375_vm6, %v1284_v47 }
 0x2e5   : > { %v1124_v37 = vpop.permute.xlu0 %1123  ;;  %v1286_v28 = vpop.permute.xlu1 %1285 }
 0x2e6   : > { %1201 = vst.msk [vmem:[#allocation2 + $0x98] sm:$0xff] %vm1181_vm5, %v1124_v37  ;;  %v1799_v44 = vld [vmem:[#allocation2 + $0x20] sm:$0xff]  ;;  %v1509_v38 = vpop.permute.xlu2 %1508 }
 0x2e7   : > { %1379 = vst.msk [vmem:[#allocation2 + $0x18] sm:$0xff] %vm1375_vm6, %v1286_v28  ;;  %2316 = vmatpush.xpose.msk.msra.mxu0 %vm1827_vm9, %v1799_v44  ;;  %v1815_v36 = vld [vmem:[#allocation2 + $0xa0] sm:$0xff] }
 0x2e8   : > { %1395 = vst.msk [vmem:[#allocation2 + $0x98] sm:$0xff] %vm1375_vm6, %v1318_v63  ;;  %2333 = vmatpush.xpose.msk.msra.mxu1 %vm1827_vm9, %v1815_v36 }
 0x2ed   : > { %v1479_v45 = vpop.permute.xlu0 %1478  ;;  %v1511_v46 = vpop.permute.xlu1 %1510 }
 0x2ee   : > { %1572 = vst.msk [vmem:[#allocation2 + $0x18] sm:$0xff] %vm1568_vm7, %v1479_v45  ;;  %v1120_v51 = vpop.permute.xlu2 %1119 }
 0x2ef   : > { %1588 = vst.msk [vmem:[#allocation2 + $0x98] sm:$0xff] %vm1568_vm7, %v1511_v46 }
 0x2f0   : > { %1765 = vst.msk [vmem:[#allocation2 + $0x18] sm:$0xff] %vm1761_vm8, %v1672_v39 }
 0x2f1   : > { %1199 = vst.msk [vmem:[#allocation2 + $0x88] sm:$0xff] %vm1181_vm5, %v1120_v51 }
 0x2f5   : > { %v1704_v1 = vpop.permute.xlu0 %1703  ;;  %v1122_v4 = vpop.permute.xlu1 %1121 }
 0x2f6   : > { %1781 = vst.msk [vmem:[#allocation2 + $0x98] sm:$0xff] %vm1761_vm8, %v1704_v1  ;;  %v1475_v9 = vpop.permute.xlu2 %1474 }
 0x2f7   : > { %1200 = vst.msk [vmem:[#allocation2 + $0x90] sm:$0xff] %vm1181_vm5, %v1122_v4  ;;  %v1798_v2 = vld [vmem:[#allocation2 + $0x18] sm:$0xff] }
 0x2f8   : > { %2317 = vmatpush.xpose.msk.msra.mxu0 %vm1827_vm9, %v1798_v2 }
 0x2fd   : > { %v1316_v43 = vpop.permute.xlu0 %1315  ;;  %v1814_v5 = vld [vmem:[#allocation2 + $0x98] sm:$0xff]  ;;  %v1477_v6 = vpop.permute.xlu1 %1476 }
 0x2fe   : > { %1394 = vst.msk [vmem:[#allocation2 + $0x90] sm:$0xff] %vm1375_vm6, %v1316_v43  ;;  %2334 = vmatpush.xpose.msk.msra.mxu1 %vm1827_vm9, %v1814_v5  ;;  %v1700_v14 = vpop.permute.xlu2 %1699 }
 0x2ff   : > { %1571 = vst.msk [vmem:[#allocation2 + $0x10] sm:$0xff] %vm1568_vm7, %v1477_v6 }
 0x300   : > { %1587 = vst.msk [vmem:[#allocation2 + $0x90] sm:$0xff] %vm1568_vm7, %v1509_v38 }
 0x305   : > { %v1670_v7 = vpop.permute.xlu0 %1669  ;;  %v1702_v8 = vpop.permute.xlu1 %1701 }
 0x306   : > { %1764 = vst.msk [vmem:[#allocation2 + $0x10] sm:$0xff] %vm1761_vm8, %v1670_v7  ;;  %v1312_v16 = vpop.permute.xlu2 %1311 }
 0x307   : > { %1780 = vst.msk [vmem:[#allocation2 + $0x90] sm:$0xff] %vm1761_vm8, %v1702_v8 }
 0x30d   : > { %v1282_v10 = vpop.permute.xlu0 %1281  ;;  %v1797_v11 = vld [vmem:[#allocation2 + $0x10] sm:$0xff]  ;;  %v1314_v12 = vpop.permute.xlu1 %1313 }
 0x30e   : > { %1377 = vst.msk [vmem:[#allocation2 + $0x8] sm:$0xff] %vm1375_vm6, %v1282_v10  ;;  %2318 = vmatpush.xpose.msk.msra.mxu0 %vm1827_vm9, %v1797_v11  ;;  %v1813_v13 = vld [vmem:[#allocation2 + $0x90] sm:$0xff]  ;;  %v1666_v20 = vpop.permute.xlu2 %1665 }
 0x30f   : > { %1393 = vst.msk [vmem:[#allocation2 + $0x88] sm:$0xff] %vm1375_vm6, %v1314_v12  ;;  %2335 = vmatpush.xpose.msk.msra.mxu1 %vm1827_vm9, %v1813_v13 }
 0x310   : > { %1570 = vst.msk [vmem:[#allocation2 + $0x8] sm:$0xff] %vm1568_vm7, %v1475_v9 }
 0x315   : > { %v1507_v15 = vpop.permute.xlu0 %1506  ;;  %v1668_v40 = vpop.permute.xlu1 %1667 }
 0x316   : > { %1586 = vst.msk [vmem:[#allocation2 + $0x88] sm:$0xff] %vm1568_vm7, %v1507_v15 }
 0x317   : > { %1763 = vst.msk [vmem:[#allocation2 + $0x8] sm:$0xff] %vm1761_vm8, %v1668_v40 }
 0x318   : > { %1779 = vst.msk [vmem:[#allocation2 + $0x88] sm:$0xff] %vm1761_vm8, %v1700_v14 }
 0x31d   : > { %v1118_v32 = vpop.permute.xlu0 %1117  ;;  %v1280_v17 = vpop.permute.xlu1 %1279 }
 0x31e   : > { %1198 = vst.msk [vmem:[#allocation2 + $0x80] sm:$0xff] %vm1181_vm5, %v1118_v32  ;;  %v1796_v18 = vld [vmem:[#allocation2 + $0x8] sm:$0xff] }
 0x31f   : > { %1376 = vst.msk [vmem:[#allocation2] sm:$0xff] %vm1375_vm6, %v1280_v17  ;;  %2319 = vmatpush.xpose.msk.msra.mxu0 %vm1827_vm9, %v1796_v18  ;;  %v1812_v19 = vld [vmem:[#allocation2 + $0x88] sm:$0xff] }
 0x320   : > { %1392 = vst.msk [vmem:[#allocation2 + $0x80] sm:$0xff] %vm1375_vm6, %v1312_v16  ;;  %2336 = vmatpush.xpose.msk.msra.mxu1 %vm1827_vm9, %v1812_v19 }
 0x325   : > { %v1473_v21 = vpop.permute.xlu0 %1472  ;;  %v1505_v22 = vpop.permute.xlu1 %1504 }
 0x326   : > { %1569 = vst.msk [vmem:[#allocation2] sm:$0xff] %vm1568_vm7, %v1473_v21 }
 0x327   : > { %1585 = vst.msk [vmem:[#allocation2 + $0x80] sm:$0xff] %vm1568_vm7, %v1505_v22 }
 0x328   : > { %1762 = vst.msk [vmem:[#allocation2] sm:$0xff] %vm1761_vm8, %v1666_v20 }
 0x32d   : > { %v1698_v23 = vpop.permute.xlu0 %1697 }
 0x32e   : > { %1778 = vst.msk [vmem:[#allocation2 + $0x80] sm:$0xff] %vm1761_vm8, %v1698_v23 }
 0x32f   : > { %v1795_v24 = vld [vmem:[#allocation2] sm:$0xff] }
 0x330   : > { %2320 = vmatpush.xpose.msk.msra.mxu0 %vm1827_vm9, %v1795_v24 }
 0x333   : > { %2321 = vmatmul.msk.f32.vlgmr.msra.gmra.mxu0 %vm1827_vm9, %v1794_v25 }
 0x335   : > { %v1811_v26 = vld [vmem:[#allocation2 + $0x80] sm:$0xff] }
 0x336   : > { %2337 = vmatpush.xpose.msk.msra.mxu1 %vm1827_vm9, %v1811_v26 }
 0x339   : > { %2338 = vmatmul.msk.f32.vlgmr.msra.gmra.mxu1 %vm1827_vm9, %v1794_v25 }
 0x3b0   : > { %v1944_v27 = vpop.f32.mrf.mxu0 }
 0x3b6   : > { %v1964_v53 = vpop.f32.mrf.mxu1 }
 0x3b7   : > { %v1967_v29 = vadd.f32 %v1964_v53, %v1944_v27 }
 0x3b9   : > { %1968 = vadd.xlane.f32.xlu1 %v1967_v29 }
 0x42c   : > { %v1969_v34 = vpop.xlane.xlu1 %1968 }
 0x42d   : > { %v1977_v49 = vmul.f32 %v1976_v33, %v1969_v34 }
 0x42f   : > { %v1978_v60 = vsub.f32 %v1944_v27, %v1977_v49  ;;  %v1979_v35 = vsub.f32 %v1964_v53, %v1977_v49 }
 0x431   : > { %v1980_v55 = vmul.f32 %v1978_v60, %v1978_v60  ;;  %v1981_v56 = vmul.f32 %v1979_v35, %v1979_v35 }
 0x433   : > { %v1982_v42 = vadd.f32 %v1981_v56, %v1980_v55 }
 0x435   : > { %1983 = vadd.xlane.f32.xlu2 %v1982_v42 }
 0x4a8   : > { %v1984_v41 = vpop.xlane.xlu2 %1983 }
 0x4a9   : > { %v1985_v61 = vmul.f32 %v1984_v41, %v1976_v33 }
 0x4ab   : > { %v1986_v63 = vadd.f32 1e-05, %v1985_v61 }
 0x4ad   : > { %2378 = vrsqrt.f32 %v1986_v63  ;;  %vm1993_vm12 = vweird.f32 %v1986_v63 }
 0x4b3   : > { %v2379_v52 = vpop.eup %2378 }
 0x4b4   : > { %v1988_v57 = vmul.f32 %v2379_v52, %v1986_v63  ;;  %vm1994_vm11 = vweird.f32 %v2379_v52 }
 0x4b5   : > { %vm1995_vm13 = vmor %vm1993_vm12, %vm1994_vm11 }
 0x4b6   : > { %v1989_v3 = vmul.f32 %v2379_v52, %v1988_v57 }
 0x4b8   : > { %v1990_v54 = vmul.f32 0.5, %v1989_v3 }
 0x4ba   : > { %v1991_v39 = vsub.f32 1.5, %v1990_v54 }
 0x4bc   : > { %v1992_v50 = vmul.f32 %v2379_v52, %v1991_v39 }
 0x4be   : > { %v1996_v48 = vsel %vm1995_vm13, %v2379_v52, %v1992_v50 }
 0x4bf   : > { %v1997_v47 = vmul.f32 %v1996_v48, %v1978_v60  ;;  %v1998_v37 = vmul.f32 %v1996_v48, %v1979_v35 }
 0x4c1   : > { %v1999_v28 = vmul.f32 0.2, %v1997_v47  ;;  %v2000_v44 = vmul.f32 0.2, %v1998_v37 }
 0x4c3   : > { %v2001_v36 = vmax.f32 %v1997_v47, %v1999_v28  ;;  %v2002_v38 = vmax.f32 %v1998_v37, %v2000_v44 }
 0x4c5   : > { %2003 = vst [vmem:[%s182_s30] sm:$0xff] %v2001_v36 }
 0x4c6   : > { %2004 = vst [vmem:[%s182_s30 + $0x8] sm:$0xff] %v2002_v38 }
 0x4c7 PF: > { %s12_s11 = sadd.s32 1, %s2402_s11   ;;  %s3695_s9 = smov %s2398_s10 }
 0x4c8   : > { %p9_p5 = scmp.ge.s32.totalorder %s12_s11, 4   ;;  %s3696_s10 = smov %s3698_s12 }
 0x4ca   :  { %11 = sbr.rel (!%p9_p5) target bundleno = 2 (0x2), region = 63 }

</bundles_post_ra>
